<compile_context>
chip_gen: v6e
topology: v6e:2x2x1
jax: 0.10.0
libtpu: 0.0.40
codegen_flags: <defaults>
</compile_context>

<pallas_src>
import jax
import jax.numpy as jnp
import numpy as np
from jax.experimental import pallas as pl
from jax.experimental.pallas import tpu as pltpu

H1 = 400            # logical hidden sizes (PyTorch module)
H2 = 300
H1P = 512           # lane-aligned padded hidden sizes used inside the kernel
H2P = 384
STATE_DIM = 1       # ShowerEnv observation_space.shape[0]
ACTION_DIM = 1      # ShowerEnv action_space.shape[0]
INIT_W = 0.003
DEFAULT_TB = 256    # batch tile: multiple of 256 (v6e/v7x MXU), 128 (v5e), 16 (bf16)


def _round_up(n, m):
    return ((n + m - 1) // m) * m


def actor_kernel(x_ref, p_ref, w2_ref, o_ref):
    # x_ref:  (TB, 1) f32 batch tile (pipelined / double-buffered).
    # p_ref:  (8, H1P) f32 packed small params, VMEM-resident across the grid.
    #         row 0: w1, row 1: b1, row 2: b2, row 3: w3^T, row 4[0]: b3.
    # w2_ref: (H1P, H2P) bf16, VMEM-resident across the grid.
    x = x_ref[...]                                            # (TB, 1) f32
    w1 = p_ref[0:1, :]                                        # (1, H1P)
    b1 = p_ref[1:2, :]                                        # (1, H1P)
    b2 = p_ref[2:3, :H2P]                                     # (1, H2P)
    w3t = p_ref[3:4, :H2P]                                    # (1, H2P)
    b3 = p_ref[4:5, 0:1]                                      # (1, 1)

    # Layer 1: state_dim == 1, so "x @ W1" is a broadcast multiply (VPU only).
    h1 = jnp.maximum(x * w1 + b1, 0.0)                        # (TB, H1P) f32

    # Layer 2: the only real matmul. bf16 operands on the MXU, f32 accumulate,
    # f32 bias/ReLU on the VPU (v5e-safe).
    h2 = jnp.dot(h1.astype(jnp.bfloat16), w2_ref[...],
                 preferred_element_type=jnp.float32) + b2
    h2 = jnp.maximum(h2, 0.0)                                 # (TB, H2P) f32

    # Layer 3: action_dim == 1, so "h2 @ W3" is a lane reduction against the
    # lane-dense transposed weight row (XLU), not an N=1 MXU matmul.
    h3 = jnp.sum(h2 * w3t, axis=-1, keepdims=True) + b3       # (TB, 1)

    o_ref[...] = jnp.tanh(h3).astype(o_ref.dtype)


def actor_forward(x, kernel_params, *, block_b=DEFAULT_TB):
    """x: (B, 1) f32; kernel_params: (packed, w2p) from pad_params_for_kernel."""
    packed, w2p = kernel_params
    B = x.shape[0]

    # Batch tile: full tiles of `block_b`; small batches shrink to a single
    # tile rounded up to a multiple of 16 (bf16 sublane packing).
    tb = min(block_b, _round_up(B, 16))
    bp = _round_up(B, tb)
    if bp != B:
        x = jnp.pad(x, ((0, bp - B), (0, 0)))   # padded rows sliced off below

    out = pl.pallas_call(
        actor_kernel,
        out_shape=jax.ShapeDtypeStruct((bp, ACTION_DIM), jnp.float32),
        grid=(pl.cdiv(bp, tb),),
        in_specs=[
            pl.BlockSpec((tb, STATE_DIM), lambda i: (i, 0)),   # batch tile
            pl.BlockSpec(packed.shape, lambda i: (0, 0)),      # resident
            pl.BlockSpec(w2p.shape, lambda i: (0, 0)),         # resident
        ],
        out_specs=pl.BlockSpec((tb, ACTION_DIM), lambda i: (i, 0)),
        compiler_params=pltpu.CompilerParams(
            dimension_semantics=("parallel",)),                # 2 TCs on v7x
    )(x, packed, w2p)
    return out[:B] if bp != B else out


def init_actor_params(key, state_dim=STATE_DIM, action_dim=ACTION_DIM,
                      h1=H1, h2=H2, init_w=INIT_W):
    """Deterministic init mirroring the PyTorch module (logical, unpadded).

    fanin_ in the reference uses size[0] of the (out, in) weight tensor as the
    fan-in, i.e. bound = 1/sqrt(out_features); biases use PyTorch's default
    nn.Linear bound = 1/sqrt(in_features).  Layer 3 weights use
    uniform(-init_w, init_w).  Weights are stored as (in, out).
    """
    ks = jax.random.split(key, 6)

    def uni(k, shape, bound):
        return jax.random.uniform(k, shape, jnp.float32, -bound, bound)

    w1 = uni(ks[0], (state_dim, h1), 1.0 / np.sqrt(h1))     # fanin_ bound
    b1 = uni(ks[1], (1, h1), 1.0 / np.sqrt(state_dim))
    w2 = uni(ks[2], (h1, h2), 1.0 / np.sqrt(h2))            # fanin_ bound
    b2 = uni(ks[3], (1, h2), 1.0 / np.sqrt(h1))
    w3 = uni(ks[4], (h2, action_dim), init_w)
    b3 = uni(ks[5], (1, action_dim), 1.0 / np.sqrt(h2))
    return (w1, b1, w2, b2, w3, b3)


def pad_params_for_kernel(params, h1p=H1P, h2p=H2P):
    """Pack small params into one (8, h1p) slab; pad + bf16-cast w2.

    Zero-padding is exact: padded layer-1/2 channels are ReLU(0) = 0 and the
    padded layer-3 weights are 0, so padded lanes never contribute.
    """
    w1, b1, w2, b2, w3, b3 = params
    h1 = w1.shape[1]
    h2 = w2.shape[1]
    assert w1.shape[0] == STATE_DIM and w3.shape[1] == ACTION_DIM, \
        "kernel structure assumes state_dim == action_dim == 1"
    packed = jnp.zeros((8, h1p), jnp.float32)
    packed = packed.at[0, :h1].set(w1[0])        # w1 row
    packed = packed.at[1, :h1].set(b1[0])        # b1 row
    packed = packed.at[2, :h2].set(b2[0])        # b2 row
    packed = packed.at[3, :h2].set(w3[:, 0])     # w3^T row (lane-dense)
    packed = packed.at[4, 0].set(b3[0, 0])       # b3 scalar
    w2p = (jnp.zeros((h1p, h2p), jnp.float32).at[:h1, :h2].set(w2)
           .astype(jnp.bfloat16))                # MXU operand only
    return (packed, w2p)


def actor_forward_ref(x, params):
    """Pure-f32 reference matching the original PyTorch forward."""
    w1, b1, w2, b2, w3, b3 = params
    h = jnp.maximum(x @ w1 + b1, 0.0)
    h = jnp.maximum(h @ w2 + b2, 0.0)
    return jnp.tanh(h @ w3 + b3)


def actor_forward_kernel_numerics_ref(x, params):
    """Reference mirroring the kernel's numerics (bf16 MXU matmul, f32 acc)."""
    w1, b1, w2, b2, w3, b3 = params
    h1 = jnp.maximum(x * w1 + b1, 0.0)
    h2 = jnp.dot(h1.astype(jnp.bfloat16), w2.astype(jnp.bfloat16),
                 preferred_element_type=jnp.float32) + b2
    h2 = jnp.maximum(h2, 0.0)
    h3 = jnp.sum(h2 * w3.T, axis=-1, keepdims=True) + b3
    return jnp.tanh(h3)


if __name__ == "__main__":
    key = jax.random.PRNGKey(0)
    pkey, xkey, xkey2 = jax.random.split(key, 3)

    params = init_actor_params(pkey)
    kernel_params = pad_params_for_kernel(params)

    fwd = jax.jit(actor_forward)

    def check(x):
        out = jax.block_until_ready(fwd(x, kernel_params))
        assert out.shape == (x.shape[0], ACTION_DIM)
        # 1) Tight check vs. a reference with identical (bf16-matmul) numerics.
        ref_kernel_num = actor_forward_kernel_numerics_ref(x, params)
        np.testing.assert_allclose(np.asarray(out), np.asarray(ref_kernel_num),
                                   rtol=1e-3, atol=1e-3)
        # 2) Looser check vs. the exact f32 PyTorch-style forward (bf16 layer-2
        #    matmul introduces ~1e-3-level differences after tanh).
        ref_f32 = actor_forward_ref(x, params)
        np.testing.assert_allclose(np.asarray(out), np.asarray(ref_f32),
                                   rtol=2e-2, atol=2e-2)

    # Full tile (amortized weight DMA, full MXU M): B = 256 shower states.
    x_big = jax.random.uniform(xkey, (256, STATE_DIM), jnp.float32, 0.0, 100.0)
    check(x_big)

    # Small / ragged batch exercising the pad-and-slice path (B = 7 -> tile 16).
    x_small = jax.random.uniform(xkey2, (7, STATE_DIM), jnp.float32, 0.0, 100.0)
    check(x_small)

    print("KERNEL_OK")
</pallas_src>

<mosaic_0001>
module attributes {stable_mosaic.version = 11 : i64} {
  func.func @actor_kernel(%arg0: i32, %arg1: memref<256x1xf32, #tpu.memory_space<vmem>>, %arg2: memref<8x512xf32, #tpu.memory_space<vmem>>, %arg3: memref<512x384xbf16, #tpu.memory_space<vmem>>, %arg4: memref<256x1xf32, #tpu.memory_space<vmem>>) attributes {dimension_semantics = [#tpu.dimension_semantics<parallel>], iteration_bounds = array<i64: 1>, scalar_prefetch = 0 : i64, scratch_operands = 0 : i64, tpu.core_type = #tpu.core_type<tc>, window_params = [{transform_indices = @transform_0, window_bounds = array<i64: 256, 1>}, {pipeline_mode = #tpu.pipeline_mode<synchronous>, transform_indices = @transform_1, window_bounds = array<i64: 8, 512>}, {pipeline_mode = #tpu.pipeline_mode<synchronous>, transform_indices = @transform_2, window_bounds = array<i64: 512, 384>}, {transform_indices = @transform_3, window_bounds = array<i64: 256, 1>}]} {
    %c0 = arith.constant 0 : index
    %c0_0 = arith.constant 0 : index
    %0 = vector.load %arg1[%c0, %c0_0] : memref<256x1xf32, #tpu.memory_space<vmem>>, vector<256x1xf32>
    %c0_1 = arith.constant 0 : index
    %c0_2 = arith.constant 0 : index
    %1 = vector.load %arg2[%c0_1, %c0_2] : memref<8x512xf32, #tpu.memory_space<vmem>>, vector<1x512xf32>
    %c1 = arith.constant 1 : index
    %c0_3 = arith.constant 0 : index
    %2 = vector.load %arg2[%c1, %c0_3] : memref<8x512xf32, #tpu.memory_space<vmem>>, vector<1x512xf32>
    %c2 = arith.constant 2 : index
    %c0_4 = arith.constant 0 : index
    %3 = vector.load %arg2[%c2, %c0_4] : memref<8x512xf32, #tpu.memory_space<vmem>>, vector<1x384xf32>
    %c3 = arith.constant 3 : index
    %c0_5 = arith.constant 0 : index
    %4 = vector.load %arg2[%c3, %c0_5] : memref<8x512xf32, #tpu.memory_space<vmem>>, vector<1x384xf32>
    %c4 = arith.constant 4 : index
    %c0_6 = arith.constant 0 : index
    %5 = vector.load %arg2[%c4, %c0_6] : memref<8x512xf32, #tpu.memory_space<vmem>>, vector<1x1xf32>
    %6 = vector.broadcast %0 : vector<256x1xf32> to vector<256x512xf32>
    %7 = vector.broadcast %1 : vector<1x512xf32> to vector<256x512xf32>
    %8 = arith.mulf %6, %7 : vector<256x512xf32>
    %9 = vector.broadcast %2 : vector<1x512xf32> to vector<256x512xf32>
    %10 = arith.addf %8, %9 : vector<256x512xf32>
    %cst = arith.constant 0.000000e+00 : f32
    %11 = vector.broadcast %cst : f32 to vector<256x512xf32>
    %12 = arith.maximumf %10, %11 : vector<256x512xf32>
    %13 = arith.truncf %12 : vector<256x512xf32> to vector<256x512xbf16>
    %c0_7 = arith.constant 0 : index
    %c0_8 = arith.constant 0 : index
    %14 = vector.load %arg3[%c0_7, %c0_8] : memref<512x384xbf16, #tpu.memory_space<vmem>>, vector<512x384xbf16>
    %cst_9 = arith.constant dense<0.000000e+00> : vector<256x384xf32>
    %15 = tpu.matmul %13, %14, %cst_9 {dimension_numbers = #tpu.dot_dimension_numbers<[1], [0], [0], [1], [0, 0, 1, 1], [], []>} : vector<256x512xbf16>, vector<512x384xbf16>, vector<256x384xf32> -> vector<256x384xf32>
    %16 = vector.broadcast %3 : vector<1x384xf32> to vector<256x384xf32>
    %17 = arith.addf %15, %16 : vector<256x384xf32>
    %cst_10 = arith.constant 0.000000e+00 : f32
    %18 = vector.broadcast %cst_10 : f32 to vector<256x384xf32>
    %19 = arith.maximumf %17, %18 : vector<256x384xf32>
    %20 = vector.broadcast %4 : vector<1x384xf32> to vector<256x384xf32>
    %21 = arith.mulf %19, %20 : vector<256x384xf32>
    %cst_11 = arith.constant dense<0.000000e+00> : vector<256xf32>
    %22 = vector.multi_reduction <add>, %21, %cst_11 [1] : vector<256x384xf32> to vector<256xf32>
    %23 = vector.shape_cast %22 : vector<256xf32> to vector<256x1xf32>
    %24 = vector.broadcast %5 : vector<1x1xf32> to vector<256x1xf32>
    %25 = arith.addf %23, %24 : vector<256x1xf32>
    %26 = math.tanh %25 : vector<256x1xf32>
    %c0_12 = arith.constant 0 : index
    %c0_13 = arith.constant 0 : index
    %27 = vector.load %arg4[%c0_12, %c0_13] : memref<256x1xf32, #tpu.memory_space<vmem>>, vector<256x1xf32>
    tpu.vector_store %arg4[%c0_12, %c0_13], %26 {strides = array<i32>} : memref<256x1xf32, #tpu.memory_space<vmem>>, vector<256x1xf32>,
    return
  }
  func.func @transform_0(%arg0: i32) -> (i32, i32) {
    %c0_i32 = arith.constant 0 : i32
    %c0_i32_0 = arith.constant 0 : i32
    return %arg0, %c0_i32 : i32, i32
  }
  func.func @transform_1(%arg0: i32) -> (i32, i32) {
    %c0_i32 = arith.constant 0 : i32
    %c0_i32_0 = arith.constant 0 : i32
    %c0_i32_1 = arith.constant 0 : i32
    return %c0_i32, %c0_i32_0 : i32, i32
  }
  func.func @transform_2(%arg0: i32) -> (i32, i32) {
    %c0_i32 = arith.constant 0 : i32
    %c0_i32_0 = arith.constant 0 : i32
    %c0_i32_1 = arith.constant 0 : i32
    return %c0_i32, %c0_i32_0 : i32, i32
  }
  func.func @transform_3(%arg0: i32) -> (i32, i32) {
    %c0_i32 = arith.constant 0 : i32
    %c0_i32_0 = arith.constant 0 : i32
    return %arg0, %c0_i32 : i32, i32
  }
}

</mosaic_0001>

<bundles_post_ra>
// kernel: actor_forward.1
= control target key start
LH: loop header
LB: loop body
LE: loop exit
PB: predicated region body
PF: predicated region fallthrough
CT: control target
= control target key end

     0   :  { %8 = vsyncpa [#allocation3], 0  ;;  %s3064_s12 = smov [#allocation2]   ;;  %s4220_s0 = inlined_call_operand.vmem [shape: f32[256,1], index: 0, kind: input, shape index: {}]   ;;  %s4221_s1 = inlined_call_operand.vmem [shape: f32[8,512], index: 1, kind: input, shape index: {}]   ;;  %s4222_s2 = inlined_call_operand.hbm [shape: bf16[512,384], index: 2, kind: input, shape index: {}]   ;;  %s4223_s3 = inlined_call_operand.vmem [shape: f32[256,1], index: 3, kind: output, shape index: {}]  }
   0x1   :  { %s18_s13 = sshll.u32 %s3064_s12, 4  ;;  %s19_s13 = int_to_ptr.vmem [resolvable:$true] %s18_s13 }
   0x2   :  { %s3050_s14 = scalar_lea.vmem %s19_s13, 12288  ;;  %p3055_p1 = scmp.lt.s32.totalorder %s19_s13, %s19_s13 }
   0x3   :  { %p3051_p0 = scmp.ne.s32.totalorder %s19_s13, %s3050_s14  ;;  %p3056_p2 = scmp.lt.s32.totalorder %s3050_s14, %s3050_s14 }
   0x5   :  { %p3057_p3 = por %p3056_p2, %p3055_p1 }
   0x7   :  { %p3058_p4 = pnand %p3057_p3, %p3051_p0 }
   0x9   :  { %3061 = shalt.err (!%p3058_p4)
}
   0xa   :  { %s3065_s15 = smov 192   ;;  %s3066_s16 = smov 12  }
   0xb   :  { %24 = dma.hbm_to_vmem [thread:$0]  %s4222_s2, 12288, %s19_s13, [#allocation3], %s3065_s15, %s3065_s15, %s3066_s16  }
   0xc   :  { %3062 = dma.done.wait [#allocation3], 12288  }
   0xd   :  { %3063 = vsyncadd [#allocation3], 4294955008  ;;  %v3067_v0 = vmov 0   ;;  %v31_v1 = vld [vmem:[%s4220_s0 + $0x10] sm:$0xff]  ;;  %v29_v2 = vld [vmem:[%s4220_s0] sm:$0xff]  ;;  %vm2483_vm0 = vcmask 7168  }
   0xe   :  { %2849 = vset.pattern.permute.xlu1 %v3067_v0  ;;  %2848 = vset.pattern.permute.xlu0 %v3067_v0  ;;  %v32_v3 = vld [vmem:[%s4220_s0 + $0x18] sm:$0xff]  ;;  %v30_v4 = vld [vmem:[%s4220_s0 + $0x8] sm:$0xff]  ;;  %v33_v6 = vld [vmem:[%s4220_s0 + $0x20] sm:$0xff] }
   0xf   :  { %81 = vperm.xlu1 %2849, %v31_v1   ;;  %71 = vperm.xlu0 %2848, %v29_v2   ;;  %v34_v5 = vld [vmem:[%s4220_s0 + $0x28] sm:$0xff]  ;;  %v36_v7 = vld [vmem:[%s4220_s0 + $0x38] sm:$0xff]  ;;  %v35_v8 = vld [vmem:[%s4220_s0 + $0x30] sm:$0xff] }
  0x10   :  { %v2850_v9 = vld [vmem:[#allocation2 + $0xac] ss:$12 sps:$4 sm:$0xff]   ;;  %v2852_v10 = vld [vmem:[#allocation2 + $0xa8] ss:$12 sps:$4 sm:$0xff]   ;;  %v37_v12 = vld [vmem:[%s4220_s0 + $0x40] sm:$0xff] }
  0x11   :  { %v38_v11 = vld [vmem:[%s4220_s0 + $0x48] sm:$0xff]  ;;  %1375 = vmatprep.subr.bf16.mxu0 %v2850_v9  ;;  %v2856_v15 = vld [vmem:[#allocation2 + $0x94] ss:$12 sps:$4 sm:$0xff]   ;;  %v2858_v16 = vld [vmem:[#allocation2 + $0x90] ss:$12 sps:$4 sm:$0xff]  }
  0x12   :  { %v2853_v13 = vld [vmem:[#allocation2 + $0x22c] ss:$12 sps:$4 sm:$0xff]   ;;  %v2855_v14 = vld [vmem:[#allocation2 + $0x228] ss:$12 sps:$4 sm:$0xff]   ;;  %1376 = vmatpush1.bf16.msra.mxu0 %v2852_v10  ;;  %v2861_v18 = vld [vmem:[#allocation2 + $0x210] ss:$12 sps:$4 sm:$0xff]  }
  0x13   :  { %86 = vperm.xlu1 %2849, %v32_v3   ;;  %76 = vperm.xlu0 %2848, %v30_v4   ;;  %v2859_v17 = vld [vmem:[#allocation2 + $0x214] ss:$12 sps:$4 sm:$0xff]   ;;  %v40_v19 = vld [vmem:[%s4220_s0 + $0x58] sm:$0xff]  ;;  %v2868_v25 = vld [vmem:[#allocation2 + $0x64] ss:$12 sps:$4 sm:$0xff]  }
  0x14   :  { %1568 = vmatprep.subr.bf16.mxu1 %v2853_v13  ;;  %1377 = vmatprep.subr.bf16.mxu0 %v2856_v15  ;;  %v2862_v20 = vld [vmem:[#allocation2 + $0x7c] ss:$12 sps:$4 sm:$0xff]   ;;  %v39_v21 = vld [vmem:[%s4220_s0 + $0x50] sm:$0xff]  ;;  %v2864_v22 = vld [vmem:[#allocation2 + $0x78] ss:$12 sps:$4 sm:$0xff]  }
  0x15   :  { %1569 = vmatpush1.bf16.msra.mxu1 %v2855_v14  ;;  %v2865_v23 = vld [vmem:[#allocation2 + $0x1fc] ss:$12 sps:$4 sm:$0xff]   ;;  %v2867_v24 = vld [vmem:[#allocation2 + $0x1f8] ss:$12 sps:$4 sm:$0xff]   ;;  %v2870_v29 = vld [vmem:[#allocation2 + $0x60] ss:$12 sps:$4 sm:$0xff]  }
  0x16   :  { %1570 = vmatprep.subr.bf16.mxu1 %v2859_v17  ;;  %1378 = vmatpush1.bf16.msra.mxu0 %v2858_v16  ;;  %v2871_v26 = vld [vmem:[#allocation2 + $0x1e4] ss:$12 sps:$4 sm:$0xff]   ;;  %v42_v27 = vld [vmem:[%s4220_s0 + $0x68] sm:$0xff]  ;;  %v44_v33 = vld [vmem:[%s4220_s0 + $0x78] sm:$0xff] }
  0x17   :  { %96 = vperm.xlu1 %2849, %v34_v5   ;;  %91 = vperm.xlu0 %2848, %v33_v6   ;;  %v41_v28 = vld [vmem:[%s4220_s0 + $0x60] sm:$0xff]  ;;  %v2874_v31 = vld [vmem:[#allocation2 + $0x4c] ss:$12 sps:$4 sm:$0xff]   ;;  %v43_v34 = vld [vmem:[%s4220_s0 + $0x70] sm:$0xff] }
  0x18   :  { %1379 = vmatprep.subr.bf16.mxu0 %v2862_v20  ;;  %v2873_v30 = vld [vmem:[#allocation2 + $0x1e0] ss:$12 sps:$4 sm:$0xff]   ;;  %v2876_v35 = vld [vmem:[#allocation2 + $0x48] ss:$12 sps:$4 sm:$0xff]   ;;  %v2882_v41 = vld [vmem:[#allocation2 + $0x30] ss:$12 sps:$4 sm:$0xff]  }
  0x19   :  { %1571 = vmatpush1.bf16.msra.mxu1 %v2861_v18  ;;  %v2877_v32 = vld [vmem:[#allocation2 + $0x1cc] ss:$12 sps:$4 sm:$0xff]   ;;  %v2879_v36 = vld [vmem:[#allocation2 + $0x1c8] ss:$12 sps:$4 sm:$0xff]   ;;  %v45_v40 = vld [vmem:[%s4220_s0 + $0x80] sm:$0xff] }
  0x1a   :  { %1572 = vmatprep.subr.bf16.mxu1 %v2865_v23  ;;  %1380 = vmatpush1.bf16.msra.mxu0 %v2864_v22  ;;  %v2880_v37 = vld [vmem:[#allocation2 + $0x34] ss:$12 sps:$4 sm:$0xff]   ;;  %v46_v39 = vld [vmem:[%s4220_s0 + $0x88] sm:$0xff]  ;;  %v2885_v42 = vld [vmem:[#allocation2 + $0x1b0] ss:$12 sps:$4 sm:$0xff]  }
  0x1b   :  { %106 = vperm.xlu1 %2849, %v36_v7   ;;  %101 = vperm.xlu0 %2848, %v35_v8   ;;  %v2883_v38 = vld [vmem:[#allocation2 + $0x1b4] ss:$12 sps:$4 sm:$0xff]   ;;  %v2886_v43 = vld [vmem:[#allocation2 + $0x1c] ss:$12 sps:$4 sm:$0xff]   ;;  %v2888_v47 = vld [vmem:[#allocation2 + $0x18] ss:$12 sps:$4 sm:$0xff]  }
  0x1c   :  { %1381 = vmatprep.subr.bf16.mxu0 %v2868_v25  ;;  %v2889_v44 = vld [vmem:[#allocation2 + $0x19c] ss:$12 sps:$4 sm:$0xff]   ;;  %v47_v46 = vld [vmem:[%s4220_s0 + $0x90] sm:$0xff]  ;;  %v2891_v48 = vld [vmem:[#allocation2 + $0x198] ss:$12 sps:$4 sm:$0xff]  }
  0x1d   :  { %1573 = vmatpush1.bf16.msra.mxu1 %v2867_v24  ;;  %v48_v45 = vld [vmem:[%s4220_s0 + $0x98] sm:$0xff]  ;;  %v2892_v49 = vld [vmem:[#allocation2 + $0x4] ss:$12 sps:$4 sm:$0xff]   ;;  %v50_v51 = vld [vmem:[%s4220_s0 + $0xa8] sm:$0xff] }
  0x1e   :  { %1574 = vmatprep.subr.bf16.mxu1 %v2871_v26  ;;  %1382 = vmatpush1.bf16.msra.mxu0 %v2870_v29  ;;  %v2895_v50 = vld [vmem:[#allocation2 + $0x184] ss:$12 sps:$4 sm:$0xff]   ;;  %v2894_v53 = vld [vmem:[#allocation2] ss:$12 sps:$4 sm:$0xff]   ;;  %v52_v57 = vld [vmem:[%s4220_s0 + $0xb8] sm:$0xff] }
  0x1f   :  { %116 = vperm.xlu1 %2849, %v38_v11   ;;  %111 = vperm.xlu0 %2848, %v37_v12   ;;  %v49_v52 = vld [vmem:[%s4220_s0 + $0xa0] sm:$0xff]  ;;  %v2898_v55 = vld [vmem:[#allocation2 + $0x16c] ss:$12 sps:$4 sm:$0xff]   ;;  %v51_v58 = vld [vmem:[%s4220_s0 + $0xb0] sm:$0xff] }
  0x20   :  { %1383 = vmatprep.subr.bf16.mxu0 %v2874_v31  ;;  %v2897_v54 = vld [vmem:[#allocation2 + $0x180] ss:$12 sps:$4 sm:$0xff]   ;;  %v2900_v59 = vld [vmem:[#allocation2 + $0x168] ss:$12 sps:$4 sm:$0xff]   ;;  %v2906_v1 = vld [vmem:[#allocation2 + $0x150] ss:$12 sps:$4 sm:$0xff]  }
  0x21   :  { %1575 = vmatpush1.bf16.msra.mxu1 %v2873_v30  ;;  %v2901_v56 = vld [vmem:[#allocation2 + $0x2ec] ss:$12 sps:$4 sm:$0xff]   ;;  %v2903_v60 = vld [vmem:[#allocation2 + $0x2e8] ss:$12 sps:$4 sm:$0xff]   ;;  %v53_v0 = vld [vmem:[%s4220_s0 + $0xc0] sm:$0xff] }
  0x22   :  { %1576 = vmatprep.subr.bf16.mxu1 %v2877_v32  ;;  %1384 = vmatpush1.bf16.msra.mxu0 %v2876_v35  ;;  %v2904_v61 = vld [vmem:[#allocation2 + $0x154] ss:$12 sps:$4 sm:$0xff]   ;;  %v54_v63 = vld [vmem:[%s4220_s0 + $0xc8] sm:$0xff]  ;;  %v2909_v2 = vld [vmem:[#allocation2 + $0x2d0] ss:$12 sps:$4 sm:$0xff]   ;;  %v230_v35 = vlaneseq }
  0x23   :  { %126 = vperm.xlu1 %2849, %v40_v19   ;;  %121 = vperm.xlu0 %2848, %v39_v21   ;;  %v2907_v62 = vld [vmem:[#allocation2 + $0x2d4] ss:$12 sps:$4 sm:$0xff]   ;;  %v2910_v3 = vld [vmem:[#allocation2 + $0x13c] ss:$12 sps:$4 sm:$0xff]   ;;  %v2912_v7 = vld [vmem:[#allocation2 + $0x138] ss:$12 sps:$4 sm:$0xff]  }
  0x24   :  { %1385 = vmatprep.subr.bf16.mxu0 %v2880_v37  ;;  %v2913_v4 = vld [vmem:[#allocation2 + $0x2bc] ss:$12 sps:$4 sm:$0xff]   ;;  %v55_v6 = vld [vmem:[%s4220_s0 + $0xd0] sm:$0xff]  ;;  %v2915_v8 = vld [vmem:[#allocation2 + $0x2b8] ss:$12 sps:$4 sm:$0xff]  }
  0x25   :  { %1577 = vmatpush1.bf16.msra.mxu1 %v2879_v36  ;;  %v56_v5 = vld [vmem:[%s4220_s0 + $0xd8] sm:$0xff]  ;;  %v2916_v9 = vld [vmem:[#allocation2 + $0x124] ss:$12 sps:$4 sm:$0xff]   ;;  %v58_v11 = vld [vmem:[%s4220_s0 + $0xe8] sm:$0xff]  ;;  %v231_v36 = vshrl.u32 %v230_v35, 7 }
  0x26   :  { %1578 = vmatprep.subr.bf16.mxu1 %v2883_v38  ;;  %1386 = vmatpush1.bf16.msra.mxu0 %v2882_v41  ;;  %v2919_v10 = vld [vmem:[#allocation2 + $0x2a4] ss:$12 sps:$4 sm:$0xff]   ;;  %v2918_v13 = vld [vmem:[#allocation2 + $0x120] ss:$12 sps:$4 sm:$0xff]   ;;  %v60_v16 = vld [vmem:[%s4220_s0 + $0xf8] sm:$0xff] }
  0x27   :  { %136 = vperm.xlu1 %2849, %v42_v27   ;;  %131 = vperm.xlu0 %2848, %v41_v28   ;;  %v57_v12 = vld [vmem:[%s4220_s0 + $0xe0] sm:$0xff]  ;;  %v2922_v15 = vld [vmem:[#allocation2 + $0x10c] ss:$12 sps:$4 sm:$0xff]   ;;  %v59_v17 = vld [vmem:[%s4220_s0 + $0xf0] sm:$0xff]  ;;  %v3187_v37 = vsub.s32 0, %v231_v36  ;;  %v3189_v38 = vsub.s32 1, %v231_v36 }
  0x28   :  { %1387 = vmatprep.subr.bf16.mxu0 %v2886_v43  ;;  %v2921_v14 = vld [vmem:[#allocation2 + $0x2a0] ss:$12 sps:$4 sm:$0xff]   ;;  %v2924_v19 = vld [vmem:[#allocation2 + $0x108] ss:$12 sps:$4 sm:$0xff]   ;;  %v2930_v23 = vld [vmem:[#allocation2 + $0xf0] ss:$12 sps:$4 sm:$0xff]  }
  0x29   :  { %1579 = vmatpush1.bf16.msra.mxu1 %v2885_v42  ;;  %v2925_v18 = vld [vmem:[#allocation2 + $0x28c] ss:$12 sps:$4 sm:$0xff]   ;;  %v2927_v20 = vld [vmem:[#allocation2 + $0x288] ss:$12 sps:$4 sm:$0xff]   ;;  %v2933_v24 = vld [vmem:[#allocation2 + $0x270] ss:$12 sps:$4 sm:$0xff]  }
  0x2a   :  { %1580 = vmatprep.subr.bf16.mxu1 %v2889_v44  ;;  %1388 = vmatpush1.bf16.msra.mxu0 %v2888_v47  ;;  %v2928_v21 = vld [vmem:[#allocation2 + $0xf4] ss:$12 sps:$4 sm:$0xff]   ;;  %v2934_v25 = vld [vmem:[#allocation2 + $0xdc] ss:$12 sps:$4 sm:$0xff]   ;;  %v2936_v27 = vld [vmem:[#allocation2 + $0xd8] ss:$12 sps:$4 sm:$0xff]  }
  0x2b   :  { %146 = vperm.xlu1 %2849, %v44_v33   ;;  %141 = vperm.xlu0 %2848, %v43_v34   ;;  %v2931_v22 = vld [vmem:[#allocation2 + $0x274] ss:$12 sps:$4 sm:$0xff]   ;;  %v2937_v26 = vld [vmem:[#allocation2 + $0x25c] ss:$12 sps:$4 sm:$0xff]   ;;  %v2939_v28 = vld [vmem:[#allocation2 + $0x258] ss:$12 sps:$4 sm:$0xff]  }
  0x2c   :  { %1389 = vmatprep.subr.bf16.mxu0 %v2892_v49  ;;  %v2940_v29 = vld [vmem:[#allocation2 + $0xc4] ss:$12 sps:$4 sm:$0xff]   ;;  %v2942_v31 = vld [vmem:[#allocation2 + $0xc0] ss:$12 sps:$4 sm:$0xff]   ;;  %4256 = vst [vmem:[#allocation5_spill] sm:$0xff] %v3187_v37  ;;  %4257 = vst [vmem:[#allocation6_spill] sm:$0xff] %v3189_v38 }
  0x2d   :  { %1581 = vmatpush1.bf16.msra.mxu1 %v2891_v48  ;;  %v2943_v30 = vld [vmem:[#allocation2 + $0x244] ss:$12 sps:$4 sm:$0xff]   ;;  %v2945_v32 = vld [vmem:[#allocation2 + $0x240] ss:$12 sps:$4 sm:$0xff]  }
  0x2e   :  { %1582 = vmatprep.subr.bf16.mxu1 %v2895_v50  ;;  %1390 = vmatpush1.bf16.msra.mxu0 %v2894_v53  ;;  %v2946_v33 = vld [vmem:[#allocation2 + $0x170] ss:$12 sps:$4 sm:$0xff]  }
  0x2f   :  { %156 = vperm.xlu1 %2849, %v46_v39   ;;  %151 = vperm.xlu0 %2848, %v45_v40   ;;  %v2948_v34 = vld [vmem:[#allocation2 + $0x2f0] ss:$12 sps:$4 sm:$0xff]   ;;  %v3191_v39 = vsub.s32 2, %v231_v36  ;;  %v244_v40 = vsub.s32 3, %v231_v36 }
  0x30   :  { %1391 = vmatprep.subr.bf16.mxu0 %v2898_v55  ;;  %v61_v41 = vld [vmem:[%s4221_s1] ss:$8 sm:$0xf]  ;;  %v2521_v44 = vld [vmem:[%s4221_s1 + $0x1] ss:$8 sm:$0xf] }
  0x31   :  { %1583 = vmatpush1.bf16.msra.mxu1 %v2897_v54  ;;  %4258 = vst [vmem:[#allocation7_spill] sm:$0xff] %v3191_v39  ;;  %v3206_v47 = vrot.slane %v61_v41, %v3191_v39  ;;  %v3208_v48 = vrot.slane %v61_v41, %v244_v40  ;;  %v3211_v49 = vrot.slane %v2521_v44, %v3189_v38  ;;  %v2947_v36 = vld [vmem:[#allocation2 + $0xb0] ss:$12 sps:$4 sm:$0xff]  }
  0x32   :  { %1584 = vmatprep.subr.bf16.mxu1 %v2901_v56  ;;  %1392 = vmatpush2.bf16.msra.mxu0 %v2900_v59  ;;  %v3217_v53 = vrot.slane %v2521_v44, %v3187_v37  ;;  %v3220_v54 = vrot.slane %v2521_v44, %v3191_v39 }
  0x33   :  { %166 = vperm.xlu1 %2849, %v48_v45   ;;  %161 = vperm.xlu0 %2848, %v47_v46   ;;  %v3200_v45 = vrot.slane %v61_v41, %v3187_v37  ;;  %v3203_v46 = vrot.slane %v61_v41, %v3189_v38 }
  0x34   :  { %1393 = vmatprep.subr.bf16.mxu0 %v2904_v61 }
  0x35   :  { %1585 = vmatpush2.bf16.msra.mxu1 %v2903_v60 }
  0x36   :  { %1586 = vmatprep.subr.bf16.mxu1 %v2907_v62  ;;  %1394 = vmatpush2.bf16.msra.mxu0 %v2906_v1 }
  0x37   :  { %176 = vperm.xlu1 %2849, %v50_v51   ;;  %171 = vperm.xlu0 %2848, %v49_v52   ;;  %v3214_v52 = vrot.slane %v2521_v44, %v244_v40  ;;  %v2949_v40 = vld [vmem:[#allocation2 + $0x230] ss:$12 sps:$4 sm:$0xff]  }
  0x38   :  { %1395 = vmatprep.subr.bf16.mxu0 %v2910_v3 }
  0x39   :  { %1587 = vmatpush2.bf16.msra.mxu1 %v2909_v2 }
  0x3a   :  { %1588 = vmatprep.subr.bf16.mxu1 %v2913_v4  ;;  %1396 = vmatpush2.bf16.msra.mxu0 %v2912_v7 }
  0x3b   :  { %186 = vperm.xlu1 %2849, %v52_v57   ;;  %181 = vperm.xlu0 %2848, %v51_v58  }
  0x3c   :  { %1397 = vmatprep.subr.bf16.mxu0 %v2916_v9 }
  0x3d   :  { %1589 = vmatpush2.bf16.msra.mxu1 %v2915_v8 }
  0x3e   :  { %1590 = vmatprep.subr.bf16.mxu1 %v2919_v10  ;;  %1398 = vmatpush2.bf16.msra.mxu0 %v2918_v13 }
  0x3f   :  { %196 = vperm.xlu1 %2849, %v54_v63   ;;  %191 = vperm.xlu0 %2848, %v53_v0  }
  0x40   :  { %1399 = vmatprep.subr.bf16.mxu0 %v2922_v15 }
  0x41   :  { %1591 = vmatpush2.bf16.msra.mxu1 %v2921_v14 }
  0x42   :  { %1592 = vmatprep.subr.bf16.mxu1 %v2925_v18  ;;  %1400 = vmatpush2.bf16.msra.mxu0 %v2924_v19 }
  0x43   :  { %206 = vperm.xlu1 %2849, %v56_v5   ;;  %201 = vperm.xlu0 %2848, %v55_v6  }
  0x44   :  { %1401 = vmatprep.subr.bf16.mxu0 %v2928_v21 }
  0x45   :  { %1593 = vmatpush2.bf16.msra.mxu1 %v2927_v20 }
  0x46   :  { %1594 = vmatprep.subr.bf16.mxu1 %v2931_v22  ;;  %1402 = vmatpush2.bf16.msra.mxu0 %v2930_v23 }
  0x47   :  { %216 = vperm.xlu1 %2849, %v58_v11   ;;  %211 = vperm.xlu0 %2848, %v57_v12  }
  0x48   :  { %1403 = vmatprep.subr.bf16.mxu0 %v2934_v25 }
  0x49   :  { %1595 = vmatpush2.bf16.msra.mxu1 %v2933_v24 }
  0x4a   :  { %1596 = vmatprep.subr.bf16.mxu1 %v2937_v26  ;;  %1404 = vmatpush2.bf16.msra.mxu0 %v2936_v27 }
  0x4b   :  { %226 = vperm.xlu1 %2849, %v60_v16   ;;  %221 = vperm.xlu0 %2848, %v59_v17  }
  0x4c   :  { %1405 = vmatprep.subr.bf16.mxu0 %v2940_v29 }
  0x4d   :  { %1597 = vmatpush2.bf16.msra.mxu1 %v2939_v28 }
  0x4e   :  { %1598 = vmatprep.subr.bf16.mxu1 %v2943_v30  ;;  %1406 = vmatpush2.bf16.msra.mxu0 %v2942_v31 }
  0x4f   :  { %2620 = vmatprep.subr.bf16.mxu0 %v2946_v33 }
  0x51   :  { %1599 = vmatpush2.bf16.msra.mxu1 %v2945_v32 }
  0x52   :  { %2732 = vmatprep.subr.bf16.mxu1 %v2948_v34 }
  0x8a   :  { %v82_v42 = vpop.permute.xlu1 %81  ;;  %v72_v43 = vpop.permute.xlu0 %71 }
  0x8b   :  { %v259_v50 = vmul.f32 %v3203_v46, %v82_v42  ;;  %v250_v55 = vmul.f32 %v3200_v45, %v72_v43  ;;  %v251_v56 = vmul.f32 %v3203_v46, %v72_v43  ;;  %v252_v57 = vmul.f32 %v3206_v47, %v72_v43 }
  0x8c   :  { %v253_v58 = vmul.f32 %v3208_v48, %v72_v43  ;;  %v261_v0 = vmul.f32 %v3208_v48, %v82_v42  ;;  %v258_v11 = vmul.f32 %v3200_v45, %v82_v42  ;;  %v260_v12 = vmul.f32 %v3206_v47, %v82_v42 }
  0x8d   :  { %v400_v7 = vadd.f32 %v3211_v49, %v251_v56  ;;  %v399_v9 = vadd.f32 %v3217_v53, %v250_v55  ;;  %v401_v10 = vadd.f32 %v3220_v54, %v252_v57  ;;  %v408_v13 = vadd.f32 %v3211_v49, %v259_v50  ;;  %v2950_v50 = vld [vmem:[#allocation2 + $0x158] ss:$12 sps:$4 sm:$0xff]  }
  0x8e   :  { %v77_v51 = vpop.permute.xlu0 %76  ;;  %v87_v59 = vpop.permute.xlu1 %86  ;;  %v402_v8 = vadd.f32 %v3214_v52, %v253_v58  ;;  %v410_v21 = vadd.f32 %v3214_v52, %v261_v0  ;;  %v407_v30 = vadd.f32 %v3217_v53, %v258_v11 }
  0x8f   :  { %v254_v60 = vmul.f32 %v3200_v45, %v77_v51  ;;  %v255_v61 = vmul.f32 %v3203_v46, %v77_v51  ;;  %v256_v62 = vmul.f32 %v3206_v47, %v77_v51  ;;  %v257_v63 = vmul.f32 %v3208_v48, %v77_v51 }
  0x90   :  { %v263_v1 = vmul.f32 %v3203_v46, %v87_v59  ;;  %v265_v2 = vmul.f32 %v3208_v48, %v87_v59  ;;  %v262_v19 = vmul.f32 %v3200_v45, %v87_v59  ;;  %v528_v23 = vmax.f32 %v400_v7, 0.0  ;;  %v2956_v7 = vld [vmem:[#allocation2 + $0x2c0] ss:$12 sps:$4 sm:$0xff]  }
  0x91   :  { %v404_v3 = vadd.f32 %v3211_v49, %v255_v61  ;;  %v406_v4 = vadd.f32 %v3214_v52, %v257_v63  ;;  %v403_v5 = vadd.f32 %v3217_v53, %v254_v60  ;;  %v405_v6 = vadd.f32 %v3220_v54, %v256_v62  ;;  %v2951_v62 = vld [vmem:[#allocation2 + $0x98] ss:$12 sps:$4 sm:$0xff]  }
  0x92   :  { %v92_v14 = vpop.permute.xlu0 %91  ;;  %v412_v20 = vadd.f32 %v3211_v49, %v263_v1  ;;  %v414_v22 = vadd.f32 %v3214_v52, %v265_v2  ;;  %v530_v24 = vmax.f32 %v402_v8, 0.0  ;;  %v527_v25 = vmax.f32 %v399_v9, 0.0  ;;  %v97_v31 = vpop.permute.xlu1 %96  ;;  %v2952_v63 = vld [vmem:[#allocation2 + $0x2d8] ss:$12 sps:$4 sm:$0xff]  }
  0x93   :  { %v532_v15 = vmax.f32 %v404_v3, 0.0  ;;  %v534_v16 = vmax.f32 %v406_v4, 0.0  ;;  %v531_v17 = vmax.f32 %v403_v5, 0.0  ;;  %v533_v18 = vmax.f32 %v405_v6, 0.0  ;;  %v2953_v4 = vld [vmem:[#allocation2 + $0x218] ss:$12 sps:$4 sm:$0xff]  }
  0x94   :  { %v529_v26 = vmax.f32 %v401_v10, 0.0  ;;  %v264_v27 = vmul.f32 %v3206_v47, %v87_v59  ;;  %v267_v28 = vmul.f32 %v3203_v46, %v92_v14  ;;  %v536_v29 = vmax.f32 %v408_v13, 0.0  ;;  %v2954_v6 = vld [vmem:[#allocation2 + $0x140] ss:$12 sps:$4 sm:$0xff]  }
  0x95   :  { %v3251_v32 = vpack.c.bf16 %v532_v15, %v528_v23  ;;  %v3253_v33 = vpack.c.bf16 %v534_v16, %v530_v24  ;;  %v3255_v34 = vpack.c.bf16 %v531_v17, %v527_v25  ;;  %v540_v41 = vmax.f32 %v412_v20, 0.0  ;;  %v2957_v20 = vld [vmem:[#allocation2 + $0x200] ss:$12 sps:$4 sm:$0xff]  }
  0x96   :  { %v3257_v35 = vpack.c.bf16 %v533_v18, %v529_v26  ;;  %v538_v42 = vmax.f32 %v410_v21, 0.0  ;;  %v542_v43 = vmax.f32 %v414_v22, 0.0  ;;  %v411_v44 = vadd.f32 %v3217_v53, %v262_v19  ;;  %v107_v9 = vpop.permute.xlu1 %106  ;;  %v102_v15 = vpop.permute.xlu0 %101  ;;  %v2955_v19 = vld [vmem:[#allocation2 + $0x80] ss:$12 sps:$4 sm:$0xff]  }
  0x97   :  { %1407 = vmatprep.mubr.bf16.mxu0 %v3251_v32  ;;  %1600 = vmatprep.mubr.bf16.mxu1 %v3253_v33  ;;  %v409_v51 = vadd.f32 %v3220_v54, %v260_v12  ;;  %v270_v55 = vmul.f32 %v3200_v45, %v97_v31  ;;  %v271_v56 = vmul.f32 %v3203_v46, %v97_v31  ;;  %v535_v61 = vmax.f32 %v407_v30, 0.0 }
  0x98   :  { %v273_v57 = vmul.f32 %v3208_v48, %v97_v31  ;;  %1408 = vmatmul.mubr.bf16.vlgmr.msra.gmra.mxu0 %v3255_v34  ;;  %1601 = vmatmul.mubr.bf16.vlgmr.msra.gmra.mxu1 %v3257_v35  ;;  %v266_v58 = vmul.f32 %v3200_v45, %v92_v14  ;;  %v269_v59 = vmul.f32 %v3208_v48, %v92_v14  ;;  %v539_v1 = vmax.f32 %v411_v44, 0.0  ;;  %v2959_v44 = vld [vmem:[#allocation2 + $0x68] ss:$12 sps:$4 sm:$0xff]  }
  0x99   :  { %2621 = vmatpush3.bf16.msra.mxu0 %v2947_v36  ;;  %2733 = vmatpush3.bf16.msra.mxu1 %v2949_v40  ;;  %v3270_v60 = vpack.c.bf16 %v540_v41, %v536_v29  ;;  %v3272_v0 = vpack.c.bf16 %v542_v43, %v538_v42  ;;  %v413_v2 = vadd.f32 %v3220_v54, %v264_v27  ;;  %v537_v5 = vmax.f32 %v409_v51, 0.0  ;;  %v2958_v36 = vld [vmem:[#allocation2 + $0x128] ss:$12 sps:$4 sm:$0xff]   ;;  %v2962_v51 = vld [vmem:[#allocation2 + $0x110] ss:$12 sps:$4 sm:$0xff]  }
  0x9a   :  { %v416_v3 = vadd.f32 %v3211_v49, %v267_v28  ;;  %2622 = vmatprep.subr.bf16.mxu0 %v2950_v50  ;;  %v268_v8 = vmul.f32 %v3206_v47, %v92_v14  ;;  %v420_v11 = vadd.f32 %v3211_v49, %v271_v56  ;;  %v418_v13 = vadd.f32 %v3214_v52, %v269_v59  ;;  %v2960_v40 = vld [vmem:[#allocation2 + $0x2a8] ss:$12 sps:$4 sm:$0xff]  }
  0x9b   :  { %1417 = vmatprep.mubr.bf16.mxu0 %v3270_v60  ;;  %1610 = vmatprep.mubr.bf16.mxu1 %v3272_v0  ;;  %v541_v10 = vmax.f32 %v413_v2, 0.0  ;;  %v3281_v16 = vpack.c.bf16 %v539_v1, %v535_v61  ;;  %v422_v17 = vadd.f32 %v3214_v52, %v273_v57  ;;  %v415_v18 = vadd.f32 %v3217_v53, %v266_v58  ;;  %v2961_v50 = vld [vmem:[#allocation2 + $0x1e8] ss:$12 sps:$4 sm:$0xff]   ;;  %v117_v61 = vpop.permute.xlu1 %116 }
  0x9c   :  { %v544_v12 = vmax.f32 %v416_v3, 0.0  ;;  %2734 = vmatprep.subr.bf16.mxu1 %v2952_v63  ;;  %v419_v14 = vadd.f32 %v3217_v53, %v270_v55  ;;  %v548_v22 = vmax.f32 %v420_v11, 0.0  ;;  %v546_v23 = vmax.f32 %v418_v13, 0.0  ;;  %v2964_v55 = vld [vmem:[#allocation2 + $0x290] ss:$12 sps:$4 sm:$0xff]  }
  0x9d   :  { %2623 = vmatpush3.bf16.msra.mxu0 %v2951_v62  ;;  %2735 = vmatpush3.bf16.msra.mxu1 %v2953_v4  ;;  %v3286_v21 = vpack.c.bf16 %v541_v10, %v537_v5  ;;  %v272_v24 = vmul.f32 %v3206_v47, %v97_v31  ;;  %v279_v25 = vmul.f32 %v3203_v46, %v107_v9  ;;  %v550_v26 = vmax.f32 %v422_v17, 0.0  ;;  %v2963_v3 = vld [vmem:[#allocation2 + $0x50] ss:$12 sps:$4 sm:$0xff]  }
  0x9e   :  { %2624 = vmatprep.subr.bf16.mxu0 %v2954_v6  ;;  %2736 = vmatprep.subr.bf16.mxu1 %v2956_v7  ;;  %v281_v27 = vmul.f32 %v3208_v48, %v107_v9  ;;  %v275_v28 = vmul.f32 %v3203_v46, %v102_v15  ;;  %v3294_v29 = vpack.c.bf16 %v548_v22, %v544_v12  ;;  %v543_v42 = vmax.f32 %v415_v18, 0.0  ;;  %v112_v6 = vpop.permute.xlu0 %111 }
  0x9f   :  { %v417_v30 = vadd.f32 %v3220_v54, %v268_v8  ;;  %v277_v41 = vmul.f32 %v3208_v48, %v102_v15  ;;  %v3298_v31 = vpack.c.bf16 %v550_v26, %v546_v23  ;;  %v547_v43 = vmax.f32 %v419_v14, 0.0  ;;  %v2968_v26 = vld [vmem:[#allocation2 + $0x278] ss:$12 sps:$4 sm:$0xff]  }
  0xa0   :  { %1418 = vmatmul.mubr.bf16.gmra.mxu0 %v3281_v16  ;;  %1611 = vmatmul.mubr.bf16.gmra.mxu1 %v3286_v21  ;;  %v274_v56 = vmul.f32 %v3200_v45, %v102_v15  ;;  %v421_v57 = vadd.f32 %v3220_v54, %v272_v24  ;;  %v424_v59 = vadd.f32 %v3211_v49, %v275_v28  ;;  %v2966_v24 = vld [vmem:[#allocation2 + $0xf8] ss:$12 sps:$4 sm:$0xff]  }
  0xa1   :  { %2625 = vmatpush3.bf16.msra.mxu0 %v2955_v19  ;;  %2737 = vmatpush3.bf16.msra.mxu1 %v2957_v20  ;;  %v545_v58 = vmax.f32 %v417_v30, 0.0  ;;  %v3305_v62 = vpack.c.bf16 %v547_v43, %v543_v42  ;;  %v428_v63 = vadd.f32 %v3211_v49, %v279_v25  ;;  %v426_v1 = vadd.f32 %v3214_v52, %v277_v41  ;;  %v2965_v19 = vld [vmem:[#allocation2 + $0x1d0] ss:$12 sps:$4 sm:$0xff]   ;;  %v2967_v25 = vld [vmem:[#allocation2 + $0x38] ss:$12 sps:$4 sm:$0xff]  }
  0xa2   :  { %1427 = vmatprep.mubr.bf16.mxu0 %v3294_v29  ;;  %1620 = vmatprep.mubr.bf16.mxu1 %v3298_v31  ;;  %v430_v2 = vadd.f32 %v3214_v52, %v281_v27  ;;  %v278_v4 = vmul.f32 %v3200_v45, %v107_v9  ;;  %v280_v5 = vmul.f32 %v3206_v47, %v107_v9  ;;  %v549_v7 = vmax.f32 %v421_v57, 0.0  ;;  %v2970_v27 = vld [vmem:[#allocation2 + $0xe0] ss:$12 sps:$4 sm:$0xff]   ;;  %v2969_v41 = vld [vmem:[#allocation2 + $0x1b8] ss:$12 sps:$4 sm:$0xff]  }
  0xa3   :  { %2626 = vmatprep.subr.bf16.mxu0 %v2958_v36  ;;  %2738 = vmatprep.subr.bf16.mxu1 %v2960_v40  ;;  %v552_v8 = vmax.f32 %v424_v59, 0.0  ;;  %v276_v10 = vmul.f32 %v3206_v47, %v102_v15  ;;  %v556_v11 = vmax.f32 %v428_v63, 0.0  ;;  %v554_v12 = vmax.f32 %v426_v1, 0.0  ;;  %v122_v59 = vpop.permute.xlu0 %121 }
  0xa4   :  { %v558_v13 = vmax.f32 %v430_v2, 0.0  ;;  %v287_v17 = vmul.f32 %v3203_v46, %v117_v61  ;;  %v289_v18 = vmul.f32 %v3208_v48, %v117_v61  ;;  %v3316_v14 = vpack.c.bf16 %v549_v7, %v545_v58  ;;  %v127_v58 = vpop.permute.xlu1 %126 }
  0xa5   :  { %2627 = vmatpush3.bf16.msra.mxu0 %v2959_v44  ;;  %2739 = vmatpush3.bf16.msra.mxu1 %v2961_v50  ;;  %v423_v9 = vadd.f32 %v3217_v53, %v274_v56  ;;  %v283_v20 = vmul.f32 %v3203_v46, %v112_v6  ;;  %v285_v22 = vmul.f32 %v3208_v48, %v112_v6 }
  0xa6   :  { %2628 = vmatprep.subr.bf16.mxu0 %v2962_v51  ;;  %2740 = vmatprep.subr.bf16.mxu1 %v2964_v55  ;;  %v3321_v15 = vpack.c.bf16 %v556_v11, %v552_v8  ;;  %v3323_v23 = vpack.c.bf16 %v558_v13, %v554_v12  ;;  %v427_v28 = vadd.f32 %v3217_v53, %v278_v4  ;;  %v2972_v51 = vld [vmem:[#allocation2 + $0x260] ss:$12 sps:$4 sm:$0xff]  }
  0xa7   :  { %v551_v30 = vmax.f32 %v423_v9, 0.0  ;;  %v425_v36 = vadd.f32 %v3220_v54, %v276_v10  ;;  %v429_v40 = vadd.f32 %v3220_v54, %v280_v5  ;;  %v432_v42 = vadd.f32 %v3211_v49, %v283_v20  ;;  %v2971_v10 = vld [vmem:[#allocation2 + $0x20] ss:$12 sps:$4 sm:$0xff]   ;;  %v2974_v20 = vld [vmem:[#allocation2 + $0xc8] ss:$12 sps:$4 sm:$0xff]  }
  0xa8   :  { %1428 = vmatmul.mubr.bf16.gmra.mxu0 %v3305_v62  ;;  %1621 = vmatmul.mubr.bf16.gmra.mxu1 %v3316_v14  ;;  %v436_v43 = vadd.f32 %v3211_v49, %v287_v17  ;;  %v434_v44 = vadd.f32 %v3214_v52, %v285_v22  ;;  %v438_v50 = vadd.f32 %v3214_v52, %v289_v18  ;;  %v555_v55 = vmax.f32 %v427_v28, 0.0  ;;  %v2973_v18 = vld [vmem:[#allocation2 + $0x1a0] ss:$12 sps:$4 sm:$0xff]   ;;  %v2977_v28 = vld [vmem:[#allocation2 + $0x188] ss:$12 sps:$4 sm:$0xff]  }
  0xa9   :  { %2629 = vmatpush3.bf16.msra.mxu0 %v2963_v3  ;;  %1437 = vmatprep.mubr.bf16.mxu0 %v3321_v15  ;;  %v553_v56 = vmax.f32 %v425_v36, 0.0  ;;  %v557_v57 = vmax.f32 %v429_v40, 0.0  ;;  %v560_v63 = vmax.f32 %v432_v42, 0.0  ;;  %v286_v4 = vmul.f32 %v3200_v45, %v117_v61 }
  0xaa   :  { %1630 = vmatprep.mubr.bf16.mxu1 %v3323_v23  ;;  %2741 = vmatpush3.bf16.msra.mxu1 %v2965_v19  ;;  %v564_v1 = vmax.f32 %v436_v43, 0.0  ;;  %v562_v2 = vmax.f32 %v434_v44, 0.0  ;;  %v566_v3 = vmax.f32 %v438_v50, 0.0  ;;  %v288_v5 = vmul.f32 %v3206_v47, %v117_v61  ;;  %v132_v43 = vpop.permute.xlu0 %131 }
  0xab   :  { %2630 = vmatprep.subr.bf16.mxu0 %v2966_v24  ;;  %2742 = vmatprep.subr.bf16.mxu1 %v2968_v26  ;;  %v3337_v7 = vpack.c.bf16 %v555_v55, %v551_v30  ;;  %v3339_v8 = vpack.c.bf16 %v557_v57, %v553_v56  ;;  %v282_v11 = vmul.f32 %v3200_v45, %v112_v6  ;;  %v2975_v24 = vld [vmem:[#allocation2 + $0x8] ss:$12 sps:$4 sm:$0xff]   ;;  %v137_v30 = vpop.permute.xlu1 %136 }
  0xac   :  { %v284_v12 = vmul.f32 %v3206_v47, %v112_v6  ;;  %v3343_v13 = vpack.c.bf16 %v564_v1, %v560_v63  ;;  %v3345_v17 = vpack.c.bf16 %v566_v3, %v562_v2  ;;  %v295_v9 = vmul.f32 %v3203_v46, %v127_v58  ;;  %v2976_v6 = vld [vmem:[#allocation2 + $0x248] ss:$12 sps:$4 sm:$0xff]  }
  0xad   :  { %2631 = vmatpush3.bf16.msra.mxu0 %v2967_v25  ;;  %v291_v61 = vmul.f32 %v3203_v46, %v122_v59  ;;  %v293_v19 = vmul.f32 %v3208_v48, %v122_v59  ;;  %v297_v22 = vmul.f32 %v3208_v48, %v127_v58  ;;  %v431_v25 = vadd.f32 %v3217_v53, %v282_v11 }
  0xae   :  { %2632 = vmatprep.subr.bf16.mxu0 %v2970_v27  ;;  %2743 = vmatpush3.bf16.msra.mxu1 %v2969_v41  ;;  %v435_v26 = vadd.f32 %v3217_v53, %v286_v4  ;;  %v433_v27 = vadd.f32 %v3220_v54, %v284_v12  ;;  %v437_v36 = vadd.f32 %v3220_v54, %v288_v5 }
  0xaf   :  { %2744 = vmatprep.subr.bf16.mxu1 %v2972_v51  ;;  %v440_v40 = vadd.f32 %v3211_v49, %v291_v61  ;;  %v444_v41 = vadd.f32 %v3211_v49, %v295_v9  ;;  %v442_v42 = vadd.f32 %v3214_v52, %v293_v19  ;;  %v559_v44 = vmax.f32 %v431_v25, 0.0 }
  0xb0   :  { %1438 = vmatmul.mubr.bf16.gmra.mxu0 %v3337_v7  ;;  %1631 = vmatmul.mubr.bf16.gmra.mxu1 %v3339_v8  ;;  %v563_v50 = vmax.f32 %v435_v26, 0.0  ;;  %v561_v51 = vmax.f32 %v433_v27, 0.0  ;;  %v446_v55 = vadd.f32 %v3214_v52, %v297_v22  ;;  %v565_v56 = vmax.f32 %v437_v36, 0.0  ;;  %v147_v22 = vpop.permute.xlu1 %146 }
  0xb1   :  { %1447 = vmatprep.mubr.bf16.mxu0 %v3343_v13  ;;  %1640 = vmatprep.mubr.bf16.mxu1 %v3345_v17  ;;  %v568_v57 = vmax.f32 %v440_v40, 0.0  ;;  %v572_v63 = vmax.f32 %v444_v41, 0.0  ;;  %v570_v1 = vmax.f32 %v442_v42, 0.0  ;;  %v294_v2 = vmul.f32 %v3200_v45, %v127_v58 }
  0xb2   :  { %2633 = vmatpush3.bf16.msra.mxu0 %v2971_v10  ;;  %2745 = vmatpush3.bf16.msra.mxu1 %v2973_v18  ;;  %v3364_v3 = vpack.c.bf16 %v563_v50, %v559_v44  ;;  %v574_v4 = vmax.f32 %v446_v55, 0.0  ;;  %v296_v5 = vmul.f32 %v3206_v47, %v127_v58  ;;  %v290_v10 = vmul.f32 %v3200_v45, %v122_v59 }
  0xb3   :  { %2634 = vmatprep.subr.bf16.mxu0 %v2974_v20  ;;  %2746 = vmatprep.subr.bf16.mxu1 %v2976_v6  ;;  %v3368_v11 = vpack.c.bf16 %v565_v56, %v561_v51  ;;  %v3370_v12 = vpack.c.bf16 %v572_v63, %v568_v57  ;;  %v292_v18 = vmul.f32 %v3206_v47, %v122_v59 }
  0xb4   :  { %v303_v9 = vmul.f32 %v3203_v46, %v137_v30  ;;  %v299_v61 = vmul.f32 %v3203_v46, %v132_v43  ;;  %v3376_v19 = vpack.c.bf16 %v574_v4, %v570_v1  ;;  %v305_v20 = vmul.f32 %v3208_v48, %v137_v30  ;;  %v157_v1 = vpop.permute.xlu1 %156 }
  0xb5   :  { %v301_v58 = vmul.f32 %v3208_v48, %v132_v43  ;;  %v302_v6 = vmul.f32 %v3200_v45, %v137_v30  ;;  %v304_v59 = vmul.f32 %v3206_v47, %v137_v30  ;;  %v298_v25 = vmul.f32 %v3200_v45, %v132_v43 }
  0xb6   :  { %2635 = vmatpush3.bf16.msra.mxu0 %v2975_v24  ;;  %2747 = vmatpush3.bf16.msra.mxu1 %v2977_v28  ;;  %4259 = vst [vmem:[#allocation8_spill] sm:$0xff] %v3376_v19  ;;  %v142_v24 = vpop.permute.xlu0 %141  ;;  %v300_v26 = vmul.f32 %v3206_v47, %v132_v43  ;;  %v439_v27 = vadd.f32 %v3217_v53, %v290_v10 }
  0xb7   :  { %v443_v28 = vadd.f32 %v3217_v53, %v294_v2  ;;  %v441_v36 = vadd.f32 %v3220_v54, %v292_v18  ;;  %v445_v40 = vadd.f32 %v3220_v54, %v296_v5  ;;  %v448_v41 = vadd.f32 %v3211_v49, %v299_v61 }
  0xb8   :  { %1448 = vmatmul.mubr.bf16.gmra.mxu0 %v3364_v3  ;;  %1641 = vmatmul.mubr.bf16.gmra.mxu1 %v3368_v11  ;;  %v452_v42 = vadd.f32 %v3211_v49, %v303_v9  ;;  %v567_v30 = vmax.f32 %v439_v27, 0.0  ;;  %v450_v50 = vadd.f32 %v3214_v52, %v301_v58  ;;  %v454_v51 = vadd.f32 %v3214_v52, %v305_v20 }
  0xb9   :  { %1457 = vmatprep.mubr.bf16.mxu0 %v3370_v12  ;;  %1650 = vmatprep.mubr.bf16.mxu1 %v3376_v19  ;;  %v571_v44 = vmax.f32 %v443_v28, 0.0  ;;  %v569_v55 = vmax.f32 %v441_v36, 0.0  ;;  %v573_v43 = vmax.f32 %v445_v40, 0.0  ;;  %v576_v56 = vmax.f32 %v448_v41, 0.0 }
  0xba   :  { %v580_v57 = vmax.f32 %v452_v42, 0.0  ;;  %v310_v63 = vmul.f32 %v3200_v45, %v147_v22  ;;  %v578_v4 = vmax.f32 %v450_v50, 0.0  ;;  %v582_v5 = vmax.f32 %v454_v51, 0.0  ;;  %v152_v9 = vpop.permute.xlu0 %151 }
  0xbb   :  { %v3396_v2 = vpack.c.bf16 %v571_v44, %v567_v30  ;;  %v311_v10 = vmul.f32 %v3203_v46, %v147_v22  ;;  %v312_v18 = vmul.f32 %v3206_v47, %v147_v22  ;;  %v3400_v61 = vpack.c.bf16 %v573_v43, %v569_v55 }
  0xbc   :  { %v3402_v58 = vpack.c.bf16 %v580_v57, %v576_v56  ;;  %v313_v20 = vmul.f32 %v3208_v48, %v147_v22  ;;  %v306_v27 = vmul.f32 %v3200_v45, %v142_v24  ;;  %v307_v28 = vmul.f32 %v3203_v46, %v142_v24 }
  0xbd   :  { %4260 = vst [vmem:[#allocation9_spill] sm:$0xff] %v3396_v2  ;;  %4261 = vst [vmem:[#allocation10_spill] sm:$0xff] %v3400_v61  ;;  %v3408_v36 = vpack.c.bf16 %v582_v5, %v578_v4  ;;  %v308_v40 = vmul.f32 %v3206_v47, %v142_v24  ;;  %v309_v41 = vmul.f32 %v3208_v48, %v142_v24 }
  0xbe   :  { %4262 = vst [vmem:[#allocation11_spill] sm:$0xff] %v3402_v58  ;;  %v318_v42 = vmul.f32 %v3200_v45, %v157_v1  ;;  %v319_v22 = vmul.f32 %v3203_v46, %v157_v1  ;;  %v320_v30 = vmul.f32 %v3206_v47, %v157_v1  ;;  %v321_v44 = vmul.f32 %v3208_v48, %v157_v1 }
  0xbf   :  { %4263 = vst [vmem:[#allocation12_spill] sm:$0xff] %v3408_v36  ;;  %v314_v50 = vmul.f32 %v3200_v45, %v152_v9  ;;  %v315_v51 = vmul.f32 %v3203_v46, %v152_v9  ;;  %v316_v24 = vmul.f32 %v3206_v47, %v152_v9  ;;  %v317_v55 = vmul.f32 %v3208_v48, %v152_v9 }
  0xc0   :  { %1458 = vmatmul.mubr.bf16.gmra.mxu0 %v3396_v2  ;;  %1651 = vmatmul.mubr.bf16.gmra.mxu1 %v3400_v61  ;;  %v447_v43 = vadd.f32 %v3217_v53, %v298_v25  ;;  %v451_v56 = vadd.f32 %v3217_v53, %v302_v6  ;;  %v449_v57 = vadd.f32 %v3220_v54, %v300_v26 }
  0xc1   :  { %1467 = vmatprep.mubr.bf16.mxu0 %v3402_v58  ;;  %1660 = vmatprep.mubr.bf16.mxu1 %v3408_v36  ;;  %v453_v4 = vadd.f32 %v3220_v54, %v304_v59  ;;  %v456_v1 = vadd.f32 %v3211_v49, %v307_v28  ;;  %v460_v39 = vadd.f32 %v3211_v49, %v311_v10  ;;  %v167_v36 = vpop.permute.xlu1 %166 }
  0xc2   :  { %v575_v5 = vmax.f32 %v447_v43, 0.0  ;;  %v458_v38 = vadd.f32 %v3214_v52, %v309_v41  ;;  %v462_v37 = vadd.f32 %v3214_v52, %v313_v20  ;;  %v579_v58 = vmax.f32 %v451_v56, 0.0 }
  0xc3   :  { %v577_v9 = vmax.f32 %v449_v57, 0.0  ;;  %v581_v61 = vmax.f32 %v453_v4, 0.0  ;;  %v584_v25 = vmax.f32 %v456_v1, 0.0  ;;  %v588_v2 = vmax.f32 %v460_v39, 0.0 }
  0xc4   :  { %v586_v6 = vmax.f32 %v458_v38, 0.0  ;;  %v590_v19 = vmax.f32 %v462_v37, 0.0  ;;  %v455_v26 = vadd.f32 %v3217_v53, %v306_v27  ;;  %v3432_v59 = vpack.c.bf16 %v579_v58, %v575_v5  ;;  %v162_v38 = vpop.permute.xlu0 %161 }
  0xc5   :  { %v3434_v28 = vpack.c.bf16 %v581_v61, %v577_v9  ;;  %v459_v10 = vadd.f32 %v3217_v53, %v310_v63  ;;  %v457_v41 = vadd.f32 %v3220_v54, %v308_v40  ;;  %v327_v20 = vmul.f32 %v3203_v46, %v167_v36 }
  0xc6   :  { %v3439_v43 = vpack.c.bf16 %v588_v2, %v584_v25  ;;  %v3441_v56 = vpack.c.bf16 %v590_v19, %v586_v6  ;;  %v461_v39 = vadd.f32 %v3220_v54, %v312_v18  ;;  %v329_v37 = vmul.f32 %v3208_v48, %v167_v36 }
  0xc7   :  { %v464_v61 = vadd.f32 %v3211_v49, %v315_v51  ;;  %v468_v63 = vadd.f32 %v3211_v49, %v319_v22  ;;  %v583_v2 = vmax.f32 %v455_v26, 0.0  ;;  %v587_v19 = vmax.f32 %v459_v10, 0.0 }
  0xc8   :  { %1468 = vmatmul.mubr.bf16.gmra.mxu0 %v3432_v59  ;;  %1661 = vmatmul.mubr.bf16.gmra.mxu1 %v3434_v28  ;;  %v466_v58 = vadd.f32 %v3214_v52, %v317_v55  ;;  %v470_v18 = vadd.f32 %v3214_v52, %v321_v44  ;;  %v585_v27 = vmax.f32 %v457_v41, 0.0  ;;  %v589_v40 = vmax.f32 %v461_v39, 0.0  ;;  %v177_v39 = vpop.permute.xlu1 %176 }
  0xc9   :  { %1477 = vmatprep.mubr.bf16.mxu0 %v3439_v43  ;;  %1670 = vmatprep.mubr.bf16.mxu1 %v3441_v56  ;;  %v592_v57 = vmax.f32 %v464_v61, 0.0  ;;  %v596_v4 = vmax.f32 %v468_v63, 0.0  ;;  %v323_v1 = vmul.f32 %v3203_v46, %v162_v38  ;;  %v325_v51 = vmul.f32 %v3208_v48, %v162_v38  ;;  %v172_v61 = vpop.permute.xlu0 %171 }
  0xca   :  { %v594_v5 = vmax.f32 %v466_v58, 0.0  ;;  %v598_v22 = vmax.f32 %v470_v18, 0.0  ;;  %v463_v9 = vadd.f32 %v3217_v53, %v314_v50  ;;  %v467_v25 = vadd.f32 %v3217_v53, %v318_v42 }
  0xcb   :  { %v465_v6 = vadd.f32 %v3220_v54, %v316_v24  ;;  %v469_v55 = vadd.f32 %v3220_v54, %v320_v30  ;;  %v3459_v26 = vpack.c.bf16 %v587_v19, %v583_v2  ;;  %v3461_v44 = vpack.c.bf16 %v589_v40, %v585_v27 }
  0xcc   :  { %v3463_v10 = vpack.c.bf16 %v596_v4, %v592_v57  ;;  %v3465_v41 = vpack.c.bf16 %v598_v22, %v594_v5  ;;  %v472_v63 = vadd.f32 %v3211_v49, %v323_v1  ;;  %v476_v50 = vadd.f32 %v3211_v49, %v327_v20 }
  0xcd   :  { %4264 = vst [vmem:[#allocation13_spill] sm:$0xff] %v3461_v44  ;;  %v474_v42 = vadd.f32 %v3214_v52, %v325_v51  ;;  %v478_v24 = vadd.f32 %v3214_v52, %v329_v37  ;;  %v326_v30 = vmul.f32 %v3200_v45, %v167_v36  ;;  %v322_v2 = vmul.f32 %v3200_v45, %v162_v38 }
  0xce   :  { %4265 = vst [vmem:[#allocation14_spill] sm:$0xff] %v3463_v10  ;;  %4266 = vst [vmem:[#allocation15_spill] sm:$0xff] %v3465_v41  ;;  %v591_v19 = vmax.f32 %v463_v9, 0.0  ;;  %v595_v58 = vmax.f32 %v467_v25, 0.0  ;;  %v328_v18 = vmul.f32 %v3206_v47, %v167_v36  ;;  %v324_v27 = vmul.f32 %v3206_v47, %v162_v38 }
  0xcf   :  { %v593_v20 = vmax.f32 %v465_v6, 0.0  ;;  %v597_v37 = vmax.f32 %v469_v55, 0.0  ;;  %v335_v40 = vmul.f32 %v3203_v46, %v177_v39  ;;  %v337_v57 = vmul.f32 %v3208_v48, %v177_v39 }
  0xd0   :  { %1478 = vmatmul.mubr.bf16.gmra.mxu0 %v3459_v26  ;;  %1671 = vmatmul.mubr.bf16.gmra.mxu1 %v3461_v44  ;;  %v331_v4 = vmul.f32 %v3203_v46, %v172_v61  ;;  %v333_v1 = vmul.f32 %v3208_v48, %v172_v61  ;;  %v600_v51 = vmax.f32 %v472_v63, 0.0  ;;  %v604_v5 = vmax.f32 %v476_v50, 0.0 }
  0xd1   :  { %1487 = vmatprep.mubr.bf16.mxu0 %v3463_v10  ;;  %1680 = vmatprep.mubr.bf16.mxu1 %v3465_v41  ;;  %v602_v22 = vmax.f32 %v474_v42, 0.0  ;;  %v606_v36 = vmax.f32 %v478_v24, 0.0  ;;  %v3483_v9 = vpack.c.bf16 %v595_v58, %v591_v19  ;;  %v471_v38 = vadd.f32 %v3217_v53, %v322_v2 }
  0xd2   :  { %v3486_v25 = vpack.c.bf16 %v597_v37, %v593_v20  ;;  %v475_v6 = vadd.f32 %v3217_v53, %v326_v30  ;;  %v473_v55 = vadd.f32 %v3220_v54, %v324_v27  ;;  %v477_v41 = vadd.f32 %v3220_v54, %v328_v18  ;;  %v187_v18 = vpop.permute.xlu1 %186  ;;  %v182_v27 = vpop.permute.xlu0 %181 }
  0xd3   :  { %4267 = vst [vmem:[#allocation16_spill] sm:$0xff] %v3483_v9  ;;  %v480_v10 = vadd.f32 %v3211_v49, %v331_v4  ;;  %v484_v44 = vadd.f32 %v3211_v49, %v335_v40  ;;  %v482_v63 = vadd.f32 %v3214_v52, %v333_v1  ;;  %v486_v50 = vadd.f32 %v3214_v52, %v337_v57 }
  0xd4   :  { %4268 = vst [vmem:[#allocation17_spill] sm:$0xff] %v3486_v25  ;;  %v334_v42 = vmul.f32 %v3200_v45, %v177_v39  ;;  %v3496_v24 = vpack.c.bf16 %v604_v5, %v600_v51  ;;  %v3498_v2 = vpack.c.bf16 %v606_v36, %v602_v22  ;;  %v336_v30 = vmul.f32 %v3206_v47, %v177_v39 }
  0xd5   :  { %v330_v19 = vmul.f32 %v3200_v45, %v172_v61  ;;  %v332_v58 = vmul.f32 %v3206_v47, %v172_v61  ;;  %v599_v20 = vmax.f32 %v471_v38, 0.0  ;;  %v603_v37 = vmax.f32 %v475_v6, 0.0 }
  0xd6   :  { %4269 = vst [vmem:[#allocation18_spill] sm:$0xff] %v3496_v24  ;;  %4270 = vst [vmem:[#allocation19_spill] sm:$0xff] %v3498_v2  ;;  %v601_v40 = vmax.f32 %v473_v55, 0.0  ;;  %v605_v57 = vmax.f32 %v477_v41, 0.0  ;;  %v608_v4 = vmax.f32 %v480_v10, 0.0  ;;  %v612_v39 = vmax.f32 %v484_v44, 0.0 }
  0xd7   :  { %v610_v1 = vmax.f32 %v482_v63, 0.0  ;;  %v614_v51 = vmax.f32 %v486_v50, 0.0  ;;  %v343_v61 = vmul.f32 %v3203_v46, %v187_v18  ;;  %v345_v5 = vmul.f32 %v3208_v48, %v187_v18  ;;  %v197_v63 = vpop.permute.xlu1 %196  ;;  %v192_v50 = vpop.permute.xlu0 %191 }
  0xd8   :  { %1488 = vmatmul.mubr.bf16.gmra.mxu0 %v3483_v9  ;;  %1681 = vmatmul.mubr.bf16.gmra.mxu1 %v3486_v25  ;;  %v339_v22 = vmul.f32 %v3203_v46, %v182_v27  ;;  %v341_v36 = vmul.f32 %v3208_v48, %v182_v27  ;;  %v481_v38 = vadd.f32 %v3220_v54, %v332_v58 }
  0xd9   :  { %1497 = vmatprep.mubr.bf16.mxu0 %v3496_v24  ;;  %1690 = vmatprep.mubr.bf16.mxu1 %v3498_v2  ;;  %v479_v24 = vadd.f32 %v3217_v53, %v330_v19  ;;  %v483_v2 = vadd.f32 %v3217_v53, %v334_v42  ;;  %v485_v41 = vadd.f32 %v3220_v54, %v336_v30 }
  0xda   :  { %v3515_v10 = vpack.c.bf16 %v603_v37, %v599_v20  ;;  %v3517_v44 = vpack.c.bf16 %v605_v57, %v601_v40  ;;  %v3519_v6 = vpack.c.bf16 %v612_v39, %v608_v4  ;;  %v3521_v55 = vpack.c.bf16 %v614_v51, %v610_v1 }
  0xdb   :  { %v488_v25 = vadd.f32 %v3211_v49, %v339_v22  ;;  %v492_v19 = vadd.f32 %v3211_v49, %v343_v61  ;;  %v490_v42 = vadd.f32 %v3214_v52, %v341_v36  ;;  %v494_v58 = vadd.f32 %v3214_v52, %v345_v5 }
  0xdc   :  { %4271 = vst [vmem:[#allocation20_spill] sm:$0xff] %v3515_v10  ;;  %4272 = vst [vmem:[#allocation21_spill] sm:$0xff] %v3517_v44  ;;  %v342_v30 = vmul.f32 %v3200_v45, %v187_v18  ;;  %v338_v20 = vmul.f32 %v3200_v45, %v182_v27  ;;  %v607_v37 = vmax.f32 %v479_v24, 0.0  ;;  %v611_v40 = vmax.f32 %v483_v2, 0.0 }
  0xdd   :  { %4273 = vst [vmem:[#allocation22_spill] sm:$0xff] %v3519_v6  ;;  %4274 = vst [vmem:[#allocation23_spill] sm:$0xff] %v3521_v55  ;;  %v344_v57 = vmul.f32 %v3206_v47, %v187_v18  ;;  %v340_v4 = vmul.f32 %v3206_v47, %v182_v27  ;;  %v609_v39 = vmax.f32 %v481_v38, 0.0  ;;  %v613_v1 = vmax.f32 %v485_v41, 0.0 }
  0xde   :  { %v351_v51 = vmul.f32 %v3203_v46, %v197_v63  ;;  %v353_v61 = vmul.f32 %v3208_v48, %v197_v63  ;;  %v347_v5 = vmul.f32 %v3203_v46, %v192_v50  ;;  %v349_v22 = vmul.f32 %v3208_v48, %v192_v50 }
  0xdf   :  { %v616_v24 = vmax.f32 %v488_v25, 0.0  ;;  %v620_v2 = vmax.f32 %v492_v19, 0.0  ;;  %v618_v36 = vmax.f32 %v490_v42, 0.0  ;;  %v622_v18 = vmax.f32 %v494_v58, 0.0 }
  0xe0   :  { %1498 = vmatmul.mubr.bf16.gmra.mxu0 %v3515_v10  ;;  %1691 = vmatmul.mubr.bf16.gmra.mxu1 %v3517_v44  ;;  %v3539_v44 = vpack.c.bf16 %v611_v40, %v607_v37  ;;  %v487_v27 = vadd.f32 %v3217_v53, %v338_v20  ;;  %v491_v38 = vadd.f32 %v3217_v53, %v342_v30 }
  0xe1   :  { %1507 = vmatprep.mubr.bf16.mxu0 %v3519_v6  ;;  %1700 = vmatprep.mubr.bf16.mxu1 %v3521_v55  ;;  %v3542_v6 = vpack.c.bf16 %v613_v1, %v609_v39  ;;  %v489_v41 = vadd.f32 %v3220_v54, %v340_v4  ;;  %v493_v55 = vadd.f32 %v3220_v54, %v344_v57  ;;  %v207_v57 = vpop.permute.xlu1 %206  ;;  %v202_v4 = vpop.permute.xlu0 %201 }
  0xe2   :  { %4275 = vst [vmem:[#allocation24_spill] sm:$0xff] %v3539_v44  ;;  %v496_v10 = vadd.f32 %v3211_v49, %v347_v5  ;;  %v500_v9 = vadd.f32 %v3211_v49, %v351_v51  ;;  %v498_v25 = vadd.f32 %v3214_v52, %v349_v22  ;;  %v502_v19 = vadd.f32 %v3214_v52, %v353_v61 }
  0xe3   :  { %4276 = vst [vmem:[#allocation25_spill] sm:$0xff] %v3542_v6  ;;  %v350_v42 = vmul.f32 %v3200_v45, %v197_v63  ;;  %v3552_v58 = vpack.c.bf16 %v620_v2, %v616_v24  ;;  %v3554_v20 = vpack.c.bf16 %v622_v18, %v618_v36  ;;  %v352_v30 = vmul.f32 %v3206_v47, %v197_v63 }
  0xe4   :  { %v346_v37 = vmul.f32 %v3200_v45, %v192_v50  ;;  %v348_v40 = vmul.f32 %v3206_v47, %v192_v50  ;;  %v615_v39 = vmax.f32 %v487_v27, 0.0  ;;  %v619_v1 = vmax.f32 %v491_v38, 0.0 }
  0xe5   :  { %4277 = vst [vmem:[#allocation26_spill] sm:$0xff] %v3552_v58  ;;  %4278 = vst [vmem:[#allocation27_spill] sm:$0xff] %v3554_v20  ;;  %v617_v51 = vmax.f32 %v489_v41, 0.0  ;;  %v621_v61 = vmax.f32 %v493_v55, 0.0  ;;  %v624_v5 = vmax.f32 %v496_v10, 0.0  ;;  %v628_v63 = vmax.f32 %v500_v9, 0.0 }
  0xe6   :  { %v626_v22 = vmax.f32 %v498_v25, 0.0  ;;  %v630_v24 = vmax.f32 %v502_v19, 0.0  ;;  %v359_v50 = vmul.f32 %v3203_v46, %v207_v57  ;;  %v361_v2 = vmul.f32 %v3208_v48, %v207_v57  ;;  %v217_v25 = vpop.permute.xlu1 %216  ;;  %v212_v19 = vpop.permute.xlu0 %211 }
  0xe7   :  { %v355_v36 = vmul.f32 %v3203_v46, %v202_v4  ;;  %v357_v18 = vmul.f32 %v3208_v48, %v202_v4  ;;  %v497_v27 = vadd.f32 %v3220_v54, %v348_v40  ;;  %v501_v55 = vadd.f32 %v3220_v54, %v352_v30 }
  0xe8   :  { %1508 = vmatmul.mubr.bf16.gmra.mxu0 %v3539_v44  ;;  %1701 = vmatmul.mubr.bf16.gmra.mxu1 %v3542_v6  ;;  %v3571_v10 = vpack.c.bf16 %v619_v1, %v615_v39  ;;  %v3573_v9 = vpack.c.bf16 %v621_v61, %v617_v51  ;;  %v3575_v38 = vpack.c.bf16 %v628_v63, %v624_v5 }
  0xe9   :  { %1517 = vmatprep.mubr.bf16.mxu0 %v3552_v58  ;;  %1710 = vmatprep.mubr.bf16.mxu1 %v3554_v20  ;;  %v495_v58 = vadd.f32 %v3217_v53, %v346_v37  ;;  %v499_v20 = vadd.f32 %v3217_v53, %v350_v42  ;;  %v3577_v41 = vpack.c.bf16 %v630_v24, %v626_v22  ;;  %v625_v63 = vmax.f32 %v497_v27, 0.0 }
  0xea   :  { %4279 = vst [vmem:[#allocation28_spill] sm:$0xff] %v3571_v10  ;;  %4280 = vst [vmem:[#allocation29_spill] sm:$0xff] %v3573_v9  ;;  %v504_v6 = vadd.f32 %v3211_v49, %v355_v36  ;;  %v508_v37 = vadd.f32 %v3211_v49, %v359_v50  ;;  %v506_v42 = vadd.f32 %v3214_v52, %v357_v18  ;;  %v629_v22 = vmax.f32 %v501_v55, 0.0 }
  0xeb   :  { %4281 = vst [vmem:[#allocation30_spill] sm:$0xff] %v3575_v38  ;;  %4282 = vst [vmem:[#allocation31_spill] sm:$0xff] %v3577_v41  ;;  %v510_v40 = vadd.f32 %v3214_v52, %v361_v2  ;;  %v358_v30 = vmul.f32 %v3200_v45, %v207_v57  ;;  %v354_v39 = vmul.f32 %v3200_v45, %v202_v4  ;;  %v623_v1 = vmax.f32 %v495_v58, 0.0 }
  0xec   :  { %v627_v51 = vmax.f32 %v499_v20, 0.0  ;;  %v360_v61 = vmul.f32 %v3206_v47, %v207_v57  ;;  %v356_v5 = vmul.f32 %v3206_v47, %v202_v4  ;;  %v367_v24 = vmul.f32 %v3203_v46, %v217_v25 }
  0xed   :  { %v369_v50 = vmul.f32 %v3208_v48, %v217_v25  ;;  %v363_v2 = vmul.f32 %v3203_v46, %v212_v19  ;;  %v365_v36 = vmul.f32 %v3208_v48, %v212_v19  ;;  %v632_v58 = vmax.f32 %v504_v6, 0.0 }
  0xee   :  { %v636_v20 = vmax.f32 %v508_v37, 0.0  ;;  %v634_v18 = vmax.f32 %v506_v42, 0.0  ;;  %v638_v57 = vmax.f32 %v510_v40, 0.0  ;;  %v503_v4 = vadd.f32 %v3217_v53, %v354_v39 }
  0xef   :  { %v507_v27 = vadd.f32 %v3217_v53, %v358_v30  ;;  %v505_v55 = vadd.f32 %v3220_v54, %v356_v5  ;;  %v516_v44 = vadd.f32 %v3211_v49, %v367_v24  ;;  %v514_v6 = vadd.f32 %v3214_v52, %v365_v36  ;;  %v222_v5 = vpop.permute.xlu0 %221 }
  0xf0   :  { %1518 = vmatmul.mubr.bf16.gmra.mxu0 %v3571_v10  ;;  %1711 = vmatmul.mubr.bf16.gmra.mxu1 %v3573_v9  ;;  %v3595_v9 = vpack.c.bf16 %v627_v51, %v623_v1  ;;  %v512_v10 = vadd.f32 %v3211_v49, %v363_v2  ;;  %v518_v37 = vadd.f32 %v3214_v52, %v369_v50 }
  0xf1   :  { %1527 = vmatprep.mubr.bf16.mxu0 %v3575_v38  ;;  %1720 = vmatprep.mubr.bf16.mxu1 %v3577_v41  ;;  %v3598_v38 = vpack.c.bf16 %v629_v22, %v625_v63  ;;  %v509_v41 = vadd.f32 %v3220_v54, %v360_v61  ;;  %v366_v42 = vmul.f32 %v3200_v45, %v217_v25  ;;  %v227_v61 = vpop.permute.xlu1 %226  ;;  %v631_v63 = vmax.f32 %v503_v4, 0.0 }
  0xf2   :  { %v3608_v40 = vpack.c.bf16 %v636_v20, %v632_v58  ;;  %v3610_v39 = vpack.c.bf16 %v638_v57, %v634_v18  ;;  %v368_v30 = vmul.f32 %v3206_v47, %v217_v25  ;;  %v362_v1 = vmul.f32 %v3200_v45, %v212_v19 }
  0xf3   :  { %4283 = vst [vmem:[#allocation32_spill] sm:$0xff] %v3598_v38  ;;  %v364_v51 = vmul.f32 %v3206_v47, %v212_v19  ;;  %v635_v22 = vmax.f32 %v507_v27, 0.0  ;;  %v633_v24 = vmax.f32 %v505_v55, 0.0  ;;  %v637_v50 = vmax.f32 %v509_v41, 0.0 }
  0xf4   :  { %4284 = vst [vmem:[#allocation33_spill] sm:$0xff] %v3608_v40  ;;  %v640_v2 = vmax.f32 %v512_v10, 0.0  ;;  %v644_v25 = vmax.f32 %v516_v44, 0.0  ;;  %v642_v36 = vmax.f32 %v514_v6, 0.0  ;;  %v646_v58 = vmax.f32 %v518_v37, 0.0 }
  0xf5   :  { %v375_v19 = vmul.f32 %v3203_v46, %v227_v61  ;;  %v377_v20 = vmul.f32 %v3208_v48, %v227_v61  ;;  %v371_v18 = vmul.f32 %v3203_v46, %v222_v5  ;;  %v373_v57 = vmul.f32 %v3208_v48, %v222_v5 }
  0xf6   :  { %v511_v4 = vadd.f32 %v3217_v53, %v362_v1  ;;  %v515_v41 = vadd.f32 %v3217_v53, %v366_v42  ;;  %v3629_v10 = vpack.c.bf16 %v644_v25, %v640_v2  ;;  %v3631_v44 = vpack.c.bf16 %v646_v58, %v642_v36 }
  0xf7   :  { %v513_v27 = vadd.f32 %v3220_v54, %v364_v51  ;;  %v517_v55 = vadd.f32 %v3220_v54, %v368_v30  ;;  %v520_v46 = vadd.f32 %v3211_v49, %v371_v18  ;;  %v524_v48 = vadd.f32 %v3211_v49, %v375_v19 }
  0xf8   :  { %1528 = vmatmul.mubr.bf16.gmra.mxu0 %v3595_v9  ;;  %1721 = vmatmul.mubr.bf16.gmra.mxu1 %v3598_v38  ;;  %v3623_v38 = vpack.c.bf16 %v635_v22, %v631_v63  ;;  %v522_v6 = vadd.f32 %v3214_v52, %v373_v57  ;;  %v526_v37 = vadd.f32 %v3214_v52, %v377_v20  ;;  %v639_v30 = vmax.f32 %v511_v4, 0.0 }
  0xf9   :  { %1537 = vmatprep.mubr.bf16.mxu0 %v3608_v40  ;;  %1730 = vmatprep.mubr.bf16.mxu1 %v3610_v39  ;;  %v3625_v40 = vpack.c.bf16 %v637_v50, %v633_v24  ;;  %v374_v42 = vmul.f32 %v3200_v45, %v227_v61  ;;  %v370_v1 = vmul.f32 %v3200_v45, %v222_v5  ;;  %v643_v51 = vmax.f32 %v515_v41, 0.0 }
  0xfa   :  { %v376_v49 = vmul.f32 %v3206_v47, %v227_v61  ;;  %v372_v63 = vmul.f32 %v3206_v47, %v222_v5  ;;  %v641_v22 = vmax.f32 %v513_v27, 0.0  ;;  %v645_v52 = vmax.f32 %v517_v55, 0.0 }
  0xfb   :  { %v648_v24 = vmax.f32 %v520_v46, 0.0  ;;  %v652_v50 = vmax.f32 %v524_v48, 0.0  ;;  %v650_v2 = vmax.f32 %v522_v6, 0.0  ;;  %v654_v25 = vmax.f32 %v526_v37, 0.0  ;;  %v4295_v6 = vld [vmem:[#allocation16_spill] sm:$0xff]  ;;  %v4296_v37 = vld [vmem:[#allocation17_spill] sm:$0xff] }
  0xfc   :  { %v3647_v36 = vpack.c.bf16 %v643_v51, %v639_v30  ;;  %v519_v45 = vadd.f32 %v3217_v53, %v370_v1  ;;  %v3650_v58 = vpack.c.bf16 %v645_v52, %v641_v22  ;;  %v523_v19 = vadd.f32 %v3217_v53, %v374_v42  ;;  %v4297_v51 = vld [vmem:[#allocation18_spill] sm:$0xff] }
  0xfd   :  { %v521_v20 = vadd.f32 %v3220_v54, %v372_v63  ;;  %v525_v61 = vadd.f32 %v3220_v54, %v376_v49  ;;  %v3655_v18 = vpack.c.bf16 %v652_v50, %v648_v24  ;;  %v3657_v47 = vpack.c.bf16 %v654_v25, %v650_v2  ;;  %v4285_v54 = vld [vmem:[#allocation8_spill] sm:$0xff]  ;;  %v4298_v49 = vld [vmem:[#allocation19_spill] sm:$0xff] }
  0xfe   :  { %v647_v5 = vmax.f32 %v519_v45, 0.0  ;;  %v651_v57 = vmax.f32 %v523_v19, 0.0 }
  0xff   :  { %v649_v4 = vmax.f32 %v521_v20, 0.0  ;;  %v653_v53 = vmax.f32 %v525_v61, 0.0 }
 0x100   :  { %1538 = vmatmul.mubr.bf16.gmra.mxu0 %v3623_v38  ;;  %1731 = vmatmul.mubr.bf16.gmra.mxu1 %v3625_v40  ;;  %v3663_v41 = vpack.c.bf16 %v651_v57, %v647_v5 }
 0x101   :  { %1547 = vmatprep.mubr.bf16.mxu0 %v3629_v10  ;;  %1740 = vmatprep.mubr.bf16.mxu1 %v3631_v44  ;;  %v3665_v27 = vpack.c.bf16 %v653_v53, %v649_v4 }
 0x108   :  { %1548 = vmatmul.mubr.bf16.gmra.mxu0 %v3647_v36  ;;  %1741 = vmatmul.mubr.bf16.gmra.mxu1 %v3650_v58 }
 0x109   :  { %1557 = vmatprep.mubr.bf16.mxu0 %v3655_v18  ;;  %1750 = vmatprep.mubr.bf16.mxu1 %v3657_v47 }
 0x110   :  { %1558 = vmatmul.mubr.bf16.gmra.mxu0 %v3663_v41  ;;  %1751 = vmatmul.mubr.bf16.gmra.mxu1 %v3665_v27 }
 0x111   :  { %1793 = vmatprep.mubr.bf16.mxu0 %v3251_v32  ;;  %1954 = vmatprep.mubr.bf16.mxu1 %v3253_v33  ;;  %v4286_v32 = vld [vmem:[#allocation9_spill] sm:$0xff]  ;;  %v4287_v33 = vld [vmem:[#allocation10_spill] sm:$0xff] }
 0x118   :  { %1794 = vmatmul.mubr.bf16.vlgmr.msra.gmra.mxu0 %v3255_v34  ;;  %1955 = vmatmul.mubr.bf16.vlgmr.msra.gmra.mxu1 %v3257_v35  ;;  %v4288_v34 = vld [vmem:[#allocation11_spill] sm:$0xff]  ;;  %v4289_v35 = vld [vmem:[#allocation12_spill] sm:$0xff] }
 0x119   :  { %1801 = vmatprep.mubr.bf16.mxu0 %v3270_v60  ;;  %1962 = vmatprep.mubr.bf16.mxu1 %v3272_v0  ;;  %v3702_v60 = vld [vmem:[%s4221_s1 + $0x2] ss:$8 sm:$0x7] }
 0x11a   :  { %v4290_v0 = vld [vmem:[#allocation5_spill] sm:$0xff] }
 0x120   :  { %1802 = vmatmul.mubr.bf16.gmra.mxu0 %v3281_v16  ;;  %1963 = vmatmul.mubr.bf16.gmra.mxu1 %v3286_v21  ;;  %v3706_v16 = vrot.slane %v3702_v60, %v4290_v0  ;;  %v4291_v21 = vld [vmem:[#allocation13_spill] sm:$0xff] }
 0x121   :  { %1809 = vmatprep.mubr.bf16.mxu0 %v3294_v29  ;;  %1970 = vmatprep.mubr.bf16.mxu1 %v3298_v31  ;;  %v4292_v29 = vld [vmem:[#allocation6_spill] sm:$0xff] }
 0x122   :  { %v3712_v31 = vrot.slane %v3702_v60, %v4292_v29 }
 0x128   :  { %1810 = vmatmul.mubr.bf16.gmra.mxu0 %v3305_v62  ;;  %1971 = vmatmul.mubr.bf16.gmra.mxu1 %v3316_v14  ;;  %v4293_v62 = vld [vmem:[#allocation14_spill] sm:$0xff]  ;;  %v4294_v14 = vld [vmem:[#allocation15_spill] sm:$0xff] }
 0x129   :  { %1817 = vmatprep.mubr.bf16.mxu0 %v3321_v15  ;;  %1978 = vmatprep.mubr.bf16.mxu1 %v3323_v23 }
 0x130   :  { %1818 = vmatmul.mubr.bf16.gmra.mxu0 %v3337_v7  ;;  %1979 = vmatmul.mubr.bf16.gmra.mxu1 %v3339_v8 }
 0x131   :  { %1825 = vmatprep.mubr.bf16.mxu0 %v3343_v13  ;;  %1986 = vmatprep.mubr.bf16.mxu1 %v3345_v17  ;;  %v3720_v17 = vld [vmem:[%s4221_s1 + $0x3] ss:$8 sm:$0x7] }
 0x132   :  { %v3730_v55 = vrot.slane %v3720_v17, %v4290_v0 }
 0x138   :  { %1826 = vmatmul.mubr.bf16.gmra.mxu0 %v3364_v3  ;;  %1987 = vmatmul.mubr.bf16.gmra.mxu1 %v3368_v11 }
 0x139   :  { %1833 = vmatprep.mubr.bf16.mxu0 %v3370_v12  ;;  %1994 = vmatprep.mubr.bf16.mxu1 %v4285_v54 }
 0x140   :  { %1834 = vmatmul.mubr.bf16.gmra.mxu0 %v4286_v32  ;;  %1995 = vmatmul.mubr.bf16.gmra.mxu1 %v4287_v33 }
 0x141   :  { %1841 = vmatprep.mubr.bf16.mxu0 %v4288_v34  ;;  %2002 = vmatprep.mubr.bf16.mxu1 %v4289_v35 }
 0x148   :  { %1842 = vmatmul.mubr.bf16.gmra.mxu0 %v3432_v59  ;;  %2003 = vmatmul.mubr.bf16.gmra.mxu1 %v3434_v28 }
 0x149   :  { %1849 = vmatprep.mubr.bf16.mxu0 %v3439_v43  ;;  %2010 = vmatprep.mubr.bf16.mxu1 %v3441_v56  ;;  %v3725_v43 = vrot.slane %v3720_v17, %v4292_v29  ;;  %v4300_v29 = vld [vmem:[#allocation21_spill] sm:$0xff] }
 0x150   :  { %1850 = vmatmul.mubr.bf16.gmra.mxu0 %v3459_v26  ;;  %2011 = vmatmul.mubr.bf16.gmra.mxu1 %v4291_v21  ;;  %v4299_v21 = vld [vmem:[#allocation20_spill] sm:$0xff] }
 0x151   :  { %1857 = vmatprep.mubr.bf16.mxu0 %v4293_v62  ;;  %2018 = vmatprep.mubr.bf16.mxu1 %v4294_v14 }
 0x158   :  { %v1409_v15 = vpop.f32.mrf.mxu0  ;;  %v1602_v23 = vpop.f32.mrf.mxu1  ;;  %1858 = vmatmul.mubr.bf16.gmra.mxu0 %v4295_v6  ;;  %2019 = vmatmul.mubr.bf16.gmra.mxu1 %v4296_v37 }
 0x159   :  { %v1410_v7 = vadd.f32 %v1409_v15, %v3706_v16  ;;  %1865 = vmatprep.mubr.bf16.mxu0 %v4297_v51  ;;  %2026 = vmatprep.mubr.bf16.mxu1 %v4298_v49 }
 0x15a   :  { %v1411_v8 = vpop.f32.mrf.mxu0  ;;  %v1604_v13 = vpop.f32.mrf.mxu1 }
 0x15b   :  { %v1603_v3 = vadd.f32 %v1602_v23, %v1410_v7  ;;  %v1412_v11 = vadd.f32 %v1411_v8, %v3712_v31  ;;  %v4301_v8 = vld [vmem:[#allocation22_spill] sm:$0xff] }
 0x15c   :  { %v1413_v12 = vpop.f32.mrf.mxu0  ;;  %v1606_v59 = vpop.f32.mrf.mxu1 }
 0x15d   :  { %v1605_v28 = vadd.f32 %v1604_v13, %v1412_v11  ;;  %v1414_v56 = vadd.f32 %v1413_v12, %v3706_v16  ;;  %v2083_v26 = vmax.f32 %v1603_v3, 0.0  ;;  %v4302_v13 = vld [vmem:[#allocation23_spill] sm:$0xff] }
 0x15e   :  { %v1415_v46 = vpop.f32.mrf.mxu0  ;;  %v1608_v48 = vpop.f32.mrf.mxu1 }
 0x15f   :  { %v2084_v42 = vmax.f32 %v1605_v28, 0.0  ;;  %v1607_v1 = vadd.f32 %v1606_v59, %v1414_v56  ;;  %v1416_v30 = vadd.f32 %v1415_v46, %v3712_v31  ;;  %v2195_v2 = vmul.f32 %v3730_v55, %v2083_v26 }
 0x160   :  { %v1419_v63 = vpop.f32.mrf.mxu0  ;;  %v1612_v50 = vpop.f32.mrf.mxu1  ;;  %1866 = vmatmul.mubr.bf16.gmra.mxu0 %v4299_v21  ;;  %2027 = vmatmul.mubr.bf16.gmra.mxu1 %v4300_v29 }
 0x161   :  { %v2196_v22 = vmul.f32 %v3725_v43, %v2084_v42  ;;  %v1609_v52 = vadd.f32 %v1608_v48, %v1416_v30  ;;  %v1420_v24 = vadd.f32 %v1419_v63, %v3706_v16  ;;  %v2086_v25 = vmax.f32 %v1607_v1, 0.0  ;;  %1873 = vmatprep.mubr.bf16.mxu0 %v4301_v8  ;;  %2034 = vmatprep.mubr.bf16.mxu1 %v4302_v13 }
 0x162   :  { %v1421_v45 = vpop.f32.mrf.mxu0  ;;  %v1614_v5 = vpop.f32.mrf.mxu1 }
 0x163   :  { %v2087_v19 = vmax.f32 %v1609_v52, 0.0  ;;  %v1613_v20 = vadd.f32 %v1612_v50, %v1420_v24  ;;  %v1422_v61 = vadd.f32 %v1421_v45, %v3712_v31  ;;  %v3741_v4 = vadd.f32 %v2196_v22, %v2195_v2  ;;  %v4303_v50 = vld [vmem:[#allocation24_spill] sm:$0xff]  ;;  %v4304_v2 = vld [vmem:[#allocation25_spill] sm:$0xff] }
 0x164   :  { %v1423_v57 = vpop.f32.mrf.mxu0  ;;  %v1616_v34 = vpop.f32.mrf.mxu1  ;;  %v2198_v35 = vmul.f32 %v3730_v55, %v2086_v25 }
 0x165   :  { %v2199_v53 = vmul.f32 %v3725_v43, %v2087_v19  ;;  %v2089_v54 = vmax.f32 %v1613_v20, 0.0  ;;  %v1615_v32 = vadd.f32 %v1614_v5, %v1422_v61  ;;  %v1424_v33 = vadd.f32 %v1423_v57, %v3706_v16  ;;  %v4305_v20 = vld [vmem:[#allocation26_spill] sm:$0xff]  ;;  %v4306_v61 = vld [vmem:[#allocation27_spill] sm:$0xff] }
 0x166   :  { %v1425_v0 = vpop.f32.mrf.mxu0  ;;  %v1618_v23 = vpop.f32.mrf.mxu1 }
 0x167   :  { %v2090_v62 = vmax.f32 %v1615_v32, 0.0  ;;  %v1617_v14 = vadd.f32 %v1616_v34, %v1424_v33  ;;  %v1426_v15 = vadd.f32 %v1425_v0, %v3712_v31  ;;  %v2201_v7 = vmul.f32 %v3730_v55, %v2089_v54 }
 0x168   :  { %v1429_v3 = vpop.f32.mrf.mxu0  ;;  %v3752_v11 = vadd.f32 %v2199_v53, %v2198_v35  ;;  %v1622_v48 = vpop.f32.mrf.mxu1  ;;  %1874 = vmatmul.mubr.bf16.gmra.mxu0 %v4303_v50  ;;  %2035 = vmatmul.mubr.bf16.gmra.mxu1 %v4304_v2 }
 0x169   :  { %v2202_v12 = vmul.f32 %v3725_v43, %v2090_v62  ;;  %v2092_v59 = vmax.f32 %v1617_v14, 0.0  ;;  %v1619_v28 = vadd.f32 %v1618_v23, %v1426_v15  ;;  %v1430_v56 = vadd.f32 %v1429_v3, %v3706_v16  ;;  %1881 = vmatprep.mubr.bf16.mxu0 %v4305_v20  ;;  %2042 = vmatprep.mubr.bf16.mxu1 %v4306_v61  ;;  %v4307_v3 = vld [vmem:[#allocation28_spill] sm:$0xff] }
 0x16a   :  { %v1431_v26 = vpop.f32.mrf.mxu0  ;;  %v1624_v49 = vpop.f32.mrf.mxu1 }
 0x16b   :  { %v2093_v46 = vmax.f32 %v1619_v28, 0.0  ;;  %v1432_v6 = vadd.f32 %v1431_v26, %v3712_v31  ;;  %v3757_v37 = vadd.f32 %v2202_v12, %v2201_v7  ;;  %v1623_v42 = vadd.f32 %v1622_v48, %v1430_v56  ;;  %v4308_v12 = vld [vmem:[#allocation29_spill] sm:$0xff]  ;;  %v4309_v26 = vld [vmem:[#allocation30_spill] sm:$0xff] }
 0x16c   :  { %v1433_v1 = vpop.f32.mrf.mxu0  ;;  %v2204_v30 = vmul.f32 %v3730_v55, %v2092_v59  ;;  %v1626_v25 = vpop.f32.mrf.mxu1 }
 0x16d   :  { %v2205_v51 = vmul.f32 %v3725_v43, %v2093_v46  ;;  %v1434_v63 = vadd.f32 %v1433_v1, %v3706_v16  ;;  %v1625_v22 = vadd.f32 %v1624_v49, %v1432_v6  ;;  %v2095_v24 = vmax.f32 %v1623_v42, 0.0  ;;  %v4310_v46 = vld [vmem:[#allocation31_spill] sm:$0xff] }
 0x16e   :  { %v1435_v52 = vpop.f32.mrf.mxu0  ;;  %v1628_v53 = vpop.f32.mrf.mxu1 }
 0x16f   :  { %v1436_v45 = vadd.f32 %v1435_v52, %v3712_v31  ;;  %v3765_v19 = vadd.f32 %v2205_v51, %v2204_v30  ;;  %v2096_v5 = vmax.f32 %v1625_v22, 0.0  ;;  %v1627_v57 = vadd.f32 %v1626_v25, %v1434_v63 }
 0x170   :  { %v2207_v34 = vmul.f32 %v3730_v55, %v2095_v24  ;;  %v1439_v35 = vpop.f32.mrf.mxu0  ;;  %v1632_v0 = vpop.f32.mrf.mxu1  ;;  %1882 = vmatmul.mubr.bf16.gmra.mxu0 %v4307_v3  ;;  %2043 = vmatmul.mubr.bf16.gmra.mxu1 %v4308_v12 }
 0x171   :  { %v2208_v54 = vmul.f32 %v3725_v43, %v2096_v5  ;;  %v2098_v32 = vmax.f32 %v1627_v57, 0.0  ;;  %v1629_v33 = vadd.f32 %v1628_v53, %v1436_v45  ;;  %v1440_v29 = vadd.f32 %v1439_v35, %v3706_v16  ;;  %1889 = vmatprep.mubr.bf16.mxu0 %v4309_v26  ;;  %2050 = vmatprep.mubr.bf16.mxu1 %v4310_v46  ;;  %v4311_v53 = vld [vmem:[#allocation32_spill] sm:$0xff]  ;;  %v4312_v35 = vld [vmem:[#allocation33_spill] sm:$0xff] }
 0x172   :  { %v1441_v62 = vpop.f32.mrf.mxu0  ;;  %v1634_v14 = vpop.f32.mrf.mxu1 }
 0x173   :  { %v2099_v21 = vmax.f32 %v1629_v33, 0.0  ;;  %v3772_v15 = vadd.f32 %v2208_v54, %v2207_v34  ;;  %v2210_v23 = vmul.f32 %v3730_v55, %v2098_v32  ;;  %v1633_v8 = vadd.f32 %v1632_v0, %v1440_v29 }
 0x174   :  { %v1442_v13 = vadd.f32 %v1441_v62, %v3712_v31  ;;  %v1443_v59 = vpop.f32.mrf.mxu0  ;;  %v1636_v28 = vpop.f32.mrf.mxu1 }
 0x175   :  { %v2211_v7 = vmul.f32 %v3725_v43, %v2099_v21  ;;  %v2101_v56 = vmax.f32 %v1633_v8, 0.0  ;;  %v1444_v6 = vadd.f32 %v1443_v59, %v3706_v16 }
 0x176   :  { %v1635_v48 = vadd.f32 %v1634_v14, %v1442_v13  ;;  %v1445_v1 = vpop.f32.mrf.mxu0  ;;  %v1638_v30 = vpop.f32.mrf.mxu1 }
 0x177   :  { %v3782_v42 = vadd.f32 %v2211_v7, %v2210_v23  ;;  %v1637_v49 = vadd.f32 %v1636_v28, %v1444_v6  ;;  %v1446_v63 = vadd.f32 %v1445_v1, %v3712_v31  ;;  %v2213_v22 = vmul.f32 %v3730_v55, %v2101_v56 }
 0x178   :  { %v2102_v51 = vmax.f32 %v1635_v48, 0.0  ;;  %v1449_v2 = vpop.f32.mrf.mxu0  ;;  %v1642_v45 = vpop.f32.mrf.mxu1  ;;  %1890 = vmatmul.mubr.bf16.gmra.mxu0 %v3595_v9  ;;  %2051 = vmatmul.mubr.bf16.gmra.mxu1 %v4311_v53 }
 0x179   :  { %v2104_v24 = vmax.f32 %v1637_v49, 0.0  ;;  %v1639_v50 = vadd.f32 %v1638_v30, %v1446_v63  ;;  %v1450_v25 = vadd.f32 %v1449_v2, %v3706_v16  ;;  %1897 = vmatprep.mubr.bf16.mxu0 %v4312_v35  ;;  %2058 = vmatprep.mubr.bf16.mxu1 %v3610_v39 }
 0x17a   :  { %v2214_v52 = vmul.f32 %v3725_v43, %v2102_v51  ;;  %v1451_v61 = vpop.f32.mrf.mxu0  ;;  %v1644_v32 = vpop.f32.mrf.mxu1 }
 0x17b   :  { %v2105_v20 = vmax.f32 %v1639_v50, 0.0  ;;  %v1643_v57 = vadd.f32 %v1642_v45, %v1450_v25  ;;  %v1452_v54 = vadd.f32 %v1451_v61, %v3712_v31  ;;  %v2216_v33 = vmul.f32 %v3730_v55, %v2104_v24 }
 0x17c   :  { %v3788_v5 = vadd.f32 %v2214_v52, %v2213_v22  ;;  %v1453_v0 = vpop.f32.mrf.mxu0  ;;  %v1646_v14 = vpop.f32.mrf.mxu1 }
 0x17d   :  { %v2217_v34 = vmul.f32 %v3725_v43, %v2105_v20  ;;  %v2107_v21 = vmax.f32 %v1643_v57, 0.0  ;;  %v1645_v29 = vadd.f32 %v1644_v32, %v1452_v54  ;;  %v1454_v62 = vadd.f32 %v1453_v0, %v3706_v16 }
 0x17e   :  { %v1455_v9 = vpop.f32.mrf.mxu0  ;;  %v1648_v3 = vpop.f32.mrf.mxu1 }
 0x17f   :  { %v3798_v23 = vadd.f32 %v2217_v34, %v2216_v33  ;;  %v2108_v7 = vmax.f32 %v1645_v29, 0.0  ;;  %v1647_v8 = vadd.f32 %v1646_v14, %v1454_v62  ;;  %v1456_v13 = vadd.f32 %v1455_v9, %v3712_v31 }
 0x180   :  { %v2219_v12 = vmul.f32 %v3730_v55, %v2107_v21  ;;  %v1459_v56 = vpop.f32.mrf.mxu0  ;;  %v1652_v46 = vpop.f32.mrf.mxu1  ;;  %1898 = vmatmul.mubr.bf16.gmra.mxu0 %v3623_v38  ;;  %2059 = vmatmul.mubr.bf16.gmra.mxu1 %v3625_v40 }
 0x181   :  { %v2220_v59 = vmul.f32 %v3725_v43, %v2108_v7  ;;  %v2110_v28 = vmax.f32 %v1647_v8, 0.0  ;;  %v1649_v39 = vadd.f32 %v1648_v3, %v1456_v13  ;;  %v1460_v26 = vadd.f32 %v1459_v56, %v3706_v16  ;;  %1905 = vmatprep.mubr.bf16.mxu0 %v3629_v10  ;;  %2066 = vmatprep.mubr.bf16.mxu1 %v3631_v44 }
 0x182   :  { %v1461_v6 = vpop.f32.mrf.mxu0  ;;  %v1654_v49 = vpop.f32.mrf.mxu1 }
 0x183   :  { %v2111_v48 = vmax.f32 %v1649_v39, 0.0  ;;  %v3806_v1 = vadd.f32 %v2220_v59, %v2219_v12  ;;  %v1653_v30 = vadd.f32 %v1652_v46, %v1460_v26  ;;  %v1462_v51 = vadd.f32 %v1461_v6, %v3712_v31 }
 0x184   :  { %v2222_v63 = vmul.f32 %v3730_v55, %v2110_v28  ;;  %v1463_v52 = vpop.f32.mrf.mxu0  ;;  %v1656_v50 = vpop.f32.mrf.mxu1 }
 0x185   :  { %v2223_v22 = vmul.f32 %v3725_v43, %v2111_v48  ;;  %v2113_v24 = vmax.f32 %v1653_v30, 0.0  ;;  %v1655_v38 = vadd.f32 %v1654_v49, %v1462_v51  ;;  %v1464_v40 = vadd.f32 %v1463_v52, %v3706_v16 }
 0x186   :  { %v1465_v2 = vpop.f32.mrf.mxu0  ;;  %v1658_v20 = vpop.f32.mrf.mxu1 }
 0x187   :  { %v3814_v25 = vadd.f32 %v2223_v22, %v2222_v63  ;;  %v2114_v45 = vmax.f32 %v1655_v38, 0.0  ;;  %v1657_v10 = vadd.f32 %v1656_v50, %v1464_v40  ;;  %v1466_v44 = vadd.f32 %v1465_v2, %v3712_v31 }
 0x188   :  { %v2225_v61 = vmul.f32 %v3730_v55, %v2113_v24  ;;  %v1469_v32 = vpop.f32.mrf.mxu0  ;;  %v1662_v33 = vpop.f32.mrf.mxu1  ;;  %1906 = vmatmul.mubr.bf16.gmra.mxu0 %v3647_v36  ;;  %2067 = vmatmul.mubr.bf16.gmra.mxu1 %v3650_v58 }
 0x189   :  { %v2226_v57 = vmul.f32 %v3725_v43, %v2114_v45  ;;  %v2116_v53 = vmax.f32 %v1657_v10, 0.0  ;;  %v1659_v54 = vadd.f32 %v1658_v20, %v1466_v44  ;;  %v1470_v35 = vadd.f32 %v1469_v32, %v3706_v16  ;;  %1913 = vmatprep.mubr.bf16.mxu0 %v3655_v18  ;;  %2074 = vmatprep.mubr.bf16.mxu1 %v3657_v47 }
 0x18a   :  { %v1471_v21 = vpop.f32.mrf.mxu0  ;;  %v1664_v29 = vpop.f32.mrf.mxu1 }
 0x18b   :  { %v2117_v34 = vmax.f32 %v1659_v54, 0.0  ;;  %v3824_v0 = vadd.f32 %v2226_v57, %v2225_v61  ;;  %v2228_v62 = vmul.f32 %v3730_v55, %v2116_v53  ;;  %v1663_v9 = vadd.f32 %v1662_v33, %v1470_v35 }
 0x18c   :  { %v1472_v36 = vadd.f32 %v1471_v21, %v3712_v31  ;;  %v1473_v7 = vpop.f32.mrf.mxu0  ;;  %v1666_v58 = vpop.f32.mrf.mxu1 }
 0x18d   :  { %v2229_v14 = vmul.f32 %v3725_v43, %v2117_v34  ;;  %v1474_v13 = vadd.f32 %v1473_v7, %v3706_v16  ;;  %v2119_v18 = vmax.f32 %v1663_v9, 0.0 }
 0x18e   :  { %v1665_v8 = vadd.f32 %v1664_v29, %v1472_v36  ;;  %v1475_v47 = vpop.f32.mrf.mxu0  ;;  %v1668_v12 = vpop.f32.mrf.mxu1 }
 0x18f   :  { %v3830_v3 = vadd.f32 %v2229_v14, %v2228_v62  ;;  %v1667_v28 = vadd.f32 %v1666_v58, %v1474_v13  ;;  %v1476_v39 = vadd.f32 %v1475_v47, %v3712_v31  ;;  %v2231_v30 = vmul.f32 %v3730_v55, %v2119_v18 }
 0x190   :  { %v2120_v59 = vmax.f32 %v1665_v8, 0.0  ;;  %v1479_v56 = vpop.f32.mrf.mxu0  ;;  %v1672_v26 = vpop.f32.mrf.mxu1  ;;  %1914 = vmatmul.mubr.bf16.gmra.mxu0 %v3663_v41  ;;  %2075 = vmatmul.mubr.bf16.gmra.mxu1 %v3665_v27 }
 0x191   :  { %v1669_v48 = vadd.f32 %v1668_v12, %v1476_v39  ;;  %v1480_v6 = vadd.f32 %v1479_v56, %v3706_v16  ;;  %v2122_v51 = vmax.f32 %v1667_v28, 0.0 }
 0x192   :  { %v2232_v46 = vmul.f32 %v3725_v43, %v2120_v59  ;;  %v1481_v49 = vpop.f32.mrf.mxu0  ;;  %v1674_v63 = vpop.f32.mrf.mxu1 }
 0x193   :  { %v2123_v22 = vmax.f32 %v1669_v48, 0.0  ;;  %v1673_v52 = vadd.f32 %v1672_v26, %v1480_v6  ;;  %v1482_v24 = vadd.f32 %v1481_v49, %v3712_v31  ;;  %v2234_v45 = vmul.f32 %v3730_v55, %v2122_v51 }
 0x194   :  { %v1483_v38 = vpop.f32.mrf.mxu0  ;;  %v1676_v40 = vpop.f32.mrf.mxu1  ;;  %v3839_v50 = vadd.f32 %v2232_v46, %v2231_v30 }
 0x195   :  { %v2235_v41 = vmul.f32 %v3725_v43, %v2123_v22  ;;  %v1675_v27 = vadd.f32 %v1674_v63, %v1482_v24  ;;  %v1484_v2 = vadd.f32 %v1483_v38, %v3706_v16  ;;  %v2125_v10 = vmax.f32 %v1673_v52, 0.0 }
 0x196   :  { %v1485_v44 = vpop.f32.mrf.mxu0  ;;  %v1678_v20 = vpop.f32.mrf.mxu1 }
 0x197   :  { %v2126_v61 = vmax.f32 %v1675_v27, 0.0  ;;  %v1677_v57 = vadd.f32 %v1676_v40, %v1484_v2  ;;  %v1486_v53 = vadd.f32 %v1485_v44, %v3712_v31  ;;  %v3845_v33 = vadd.f32 %v2235_v41, %v2234_v45 }
 0x198   :  { %v1489_v54 = vpop.f32.mrf.mxu0  ;;  %v1682_v32 = vpop.f32.mrf.mxu1  ;;  %v2237_v29 = vmul.f32 %v3730_v55, %v2125_v10 }
 0x199   :  { %v2238_v34 = vmul.f32 %v3725_v43, %v2126_v61  ;;  %v1679_v35 = vadd.f32 %v1678_v20, %v1486_v53  ;;  %v1490_v21 = vadd.f32 %v1489_v54, %v3706_v16  ;;  %v2128_v62 = vmax.f32 %v1677_v57, 0.0 }
 0x19a   :  { %v1491_v14 = vpop.f32.mrf.mxu0  ;;  %v1684_v9 = vpop.f32.mrf.mxu1 }
 0x19b   :  { %v2129_v36 = vmax.f32 %v1679_v35, 0.0  ;;  %v1683_v7 = vadd.f32 %v1682_v32, %v1490_v21  ;;  %v1492_v58 = vadd.f32 %v1491_v14, %v3712_v31  ;;  %v3851_v18 = vadd.f32 %v2238_v34, %v2237_v29 }
 0x19c   :  { %v1493_v8 = vpop.f32.mrf.mxu0  ;;  %v1686_v13 = vpop.f32.mrf.mxu1  ;;  %v2240_v28 = vmul.f32 %v3730_v55, %v2128_v62 }
 0x19d   :  { %v2241_v47 = vmul.f32 %v3725_v43, %v2129_v36  ;;  %v1685_v12 = vadd.f32 %v1684_v9, %v1492_v58  ;;  %v1494_v59 = vadd.f32 %v1493_v8, %v3706_v16  ;;  %v2131_v39 = vmax.f32 %v1683_v7, 0.0 }
 0x19e   :  { %v1495_v56 = vpop.f32.mrf.mxu0  ;;  %v1688_v26 = vpop.f32.mrf.mxu1 }
 0x19f   :  { %v2132_v46 = vmax.f32 %v1685_v12, 0.0  ;;  %v1687_v48 = vadd.f32 %v1686_v13, %v1494_v59  ;;  %v1496_v6 = vadd.f32 %v1495_v56, %v3712_v31  ;;  %v3857_v49 = vadd.f32 %v2241_v47, %v2240_v28 }
 0x1a0   :  { %v1499_v30 = vpop.f32.mrf.mxu0  ;;  %v1692_v51 = vpop.f32.mrf.mxu1  ;;  %v2243_v24 = vmul.f32 %v3730_v55, %v2131_v39 }
 0x1a1   :  { %v2244_v63 = vmul.f32 %v3725_v43, %v2132_v46  ;;  %v1689_v22 = vadd.f32 %v1688_v26, %v1496_v6  ;;  %v1500_v52 = vadd.f32 %v1499_v30, %v3706_v16  ;;  %v2134_v38 = vmax.f32 %v1687_v48, 0.0 }
 0x1a2   :  { %v1501_v40 = vpop.f32.mrf.mxu0  ;;  %v1694_v41 = vpop.f32.mrf.mxu1 }
 0x1a3   :  { %v2135_v27 = vmax.f32 %v1689_v22, 0.0  ;;  %v1693_v2 = vadd.f32 %v1692_v51, %v1500_v52  ;;  %v1502_v45 = vadd.f32 %v1501_v40, %v3712_v31  ;;  %v3863_v20 = vadd.f32 %v2244_v63, %v2243_v24 }
 0x1a4   :  { %v1503_v10 = vpop.f32.mrf.mxu0  ;;  %v1696_v44 = vpop.f32.mrf.mxu1  ;;  %v2246_v54 = vmul.f32 %v3730_v55, %v2134_v38 }
 0x1a5   :  { %v2247_v61 = vmul.f32 %v3725_v43, %v2135_v27  ;;  %v1695_v57 = vadd.f32 %v1694_v41, %v1502_v45  ;;  %v1504_v53 = vadd.f32 %v1503_v10, %v3706_v16  ;;  %v2137_v32 = vmax.f32 %v1693_v2, 0.0 }
 0x1a6   :  { %v1505_v34 = vpop.f32.mrf.mxu0  ;;  %v1698_v35 = vpop.f32.mrf.mxu1 }
 0x1a7   :  { %v2138_v21 = vmax.f32 %v1695_v57, 0.0  ;;  %v1697_v29 = vadd.f32 %v1696_v44, %v1504_v53  ;;  %v1506_v62 = vadd.f32 %v1505_v34, %v3712_v31  ;;  %v3869_v36 = vadd.f32 %v2247_v61, %v2246_v54 }
 0x1a8   :  { %v1509_v14 = vpop.f32.mrf.mxu0  ;;  %v1702_v9 = vpop.f32.mrf.mxu1  ;;  %v2249_v13 = vmul.f32 %v3730_v55, %v2137_v32 }
 0x1a9   :  { %v2250_v7 = vmul.f32 %v3725_v43, %v2138_v21  ;;  %v1699_v58 = vadd.f32 %v1698_v35, %v1506_v62  ;;  %v1510_v8 = vadd.f32 %v1509_v14, %v3706_v16  ;;  %v2140_v47 = vmax.f32 %v1697_v29, 0.0 }
 0x1aa   :  { %v1511_v12 = vpop.f32.mrf.mxu0  ;;  %v1704_v59 = vpop.f32.mrf.mxu1 }
 0x1ab   :  { %v2141_v28 = vmax.f32 %v1699_v58, 0.0  ;;  %v1703_v39 = vadd.f32 %v1702_v9, %v1510_v8  ;;  %v1512_v56 = vadd.f32 %v1511_v12, %v3712_v31  ;;  %v3875_v48 = vadd.f32 %v2250_v7, %v2249_v13 }
 0x1ac   :  { %v1513_v26 = vpop.f32.mrf.mxu0  ;;  %v1706_v46 = vpop.f32.mrf.mxu1  ;;  %v2252_v63 = vmul.f32 %v3730_v55, %v2140_v47 }
 0x1ad   :  { %v2253_v6 = vmul.f32 %v3725_v43, %v2141_v28  ;;  %v1705_v30 = vadd.f32 %v1704_v59, %v1512_v56  ;;  %v1514_v51 = vadd.f32 %v1513_v26, %v3706_v16  ;;  %v2143_v22 = vmax.f32 %v1703_v39, 0.0 }
 0x1ae   :  { %v1515_v52 = vpop.f32.mrf.mxu0  ;;  %v1708_v24 = vpop.f32.mrf.mxu1 }
 0x1af   :  { %v2144_v38 = vmax.f32 %v1705_v30, 0.0  ;;  %v1707_v40 = vadd.f32 %v1706_v46, %v1514_v51  ;;  %v1516_v41 = vadd.f32 %v1515_v52, %v3712_v31  ;;  %v3881_v45 = vadd.f32 %v2253_v6, %v2252_v63 }
 0x1b0   :  { %v1519_v27 = vpop.f32.mrf.mxu0  ;;  %v1712_v2 = vpop.f32.mrf.mxu1  ;;  %v2255_v57 = vmul.f32 %v3730_v55, %v2143_v22 }
 0x1b1   :  { %v2256_v10 = vmul.f32 %v3725_v43, %v2144_v38  ;;  %v1709_v44 = vadd.f32 %v1708_v24, %v1516_v41  ;;  %v1520_v61 = vadd.f32 %v1519_v27, %v3706_v16  ;;  %v2146_v53 = vmax.f32 %v1707_v40, 0.0 }
 0x1b2   :  { %v1521_v54 = vpop.f32.mrf.mxu0  ;;  %v1714_v32 = vpop.f32.mrf.mxu1 }
 0x1b3   :  { %v2147_v34 = vmax.f32 %v1709_v44, 0.0  ;;  %v1713_v35 = vadd.f32 %v1712_v2, %v1520_v61  ;;  %v1522_v21 = vadd.f32 %v1521_v54, %v3712_v31  ;;  %v3887_v14 = vadd.f32 %v2256_v10, %v2255_v57 }
 0x1b4   :  { %v1523_v29 = vpop.f32.mrf.mxu0  ;;  %v1716_v62 = vpop.f32.mrf.mxu1  ;;  %v2258_v8 = vmul.f32 %v3730_v55, %v2146_v53 }
 0x1b5   :  { %v2259_v9 = vmul.f32 %v3725_v43, %v2147_v34  ;;  %v1715_v7 = vadd.f32 %v1714_v32, %v1522_v21  ;;  %v1524_v58 = vadd.f32 %v1523_v29, %v3706_v16  ;;  %v2149_v13 = vmax.f32 %v1713_v35, 0.0 }
 0x1b6   :  { %v1525_v47 = vpop.f32.mrf.mxu0  ;;  %v1718_v12 = vpop.f32.mrf.mxu1 }
 0x1b7   :  { %v2150_v59 = vmax.f32 %v1715_v7, 0.0  ;;  %v1717_v28 = vadd.f32 %v1716_v62, %v1524_v58  ;;  %v1526_v39 = vadd.f32 %v1525_v47, %v3712_v31  ;;  %v3893_v46 = vadd.f32 %v2259_v9, %v2258_v8 }
 0x1b8   :  { %v1529_v56 = vpop.f32.mrf.mxu0  ;;  %v1722_v26 = vpop.f32.mrf.mxu1  ;;  %v2261_v63 = vmul.f32 %v3730_v55, %v2149_v13 }
 0x1b9   :  { %v2262_v6 = vmul.f32 %v3725_v43, %v2150_v59  ;;  %v1719_v30 = vadd.f32 %v1718_v12, %v1526_v39  ;;  %v1530_v51 = vadd.f32 %v1529_v56, %v3706_v16  ;;  %v2152_v22 = vmax.f32 %v1717_v28, 0.0 }
 0x1ba   :  { %v1531_v52 = vpop.f32.mrf.mxu0  ;;  %v1724_v24 = vpop.f32.mrf.mxu1 }
 0x1bb   :  { %v2153_v38 = vmax.f32 %v1719_v30, 0.0  ;;  %v1723_v40 = vadd.f32 %v1722_v26, %v1530_v51  ;;  %v1532_v41 = vadd.f32 %v1531_v52, %v3712_v31  ;;  %v3899_v10 = vadd.f32 %v2262_v6, %v2261_v63 }
 0x1bc   :  { %v1533_v27 = vpop.f32.mrf.mxu0  ;;  %v1726_v2 = vpop.f32.mrf.mxu1  ;;  %v2264_v53 = vmul.f32 %v3730_v55, %v2152_v22 }
 0x1bd   :  { %v2265_v44 = vmul.f32 %v3725_v43, %v2153_v38  ;;  %v1725_v61 = vadd.f32 %v1724_v24, %v1532_v41  ;;  %v1534_v57 = vadd.f32 %v1533_v27, %v3706_v16  ;;  %v2155_v54 = vmax.f32 %v1723_v40, 0.0 }
 0x1be   :  { %v1535_v32 = vpop.f32.mrf.mxu0  ;;  %v1728_v34 = vpop.f32.mrf.mxu1 }
 0x1bf   :  { %v2156_v35 = vmax.f32 %v1725_v61, 0.0  ;;  %v1727_v21 = vadd.f32 %v1726_v2, %v1534_v57  ;;  %v1536_v29 = vadd.f32 %v1535_v32, %v3712_v31  ;;  %v3905_v7 = vadd.f32 %v2265_v44, %v2264_v53 }
 0x1c0   :  { %v1539_v62 = vpop.f32.mrf.mxu0  ;;  %v1732_v9 = vpop.f32.mrf.mxu1  ;;  %v2267_v47 = vmul.f32 %v3730_v55, %v2155_v54 }
 0x1c1   :  { %v2268_v58 = vmul.f32 %v3725_v43, %v2156_v35  ;;  %v1729_v8 = vadd.f32 %v1728_v34, %v1536_v29  ;;  %v1540_v13 = vadd.f32 %v1539_v62, %v3706_v16  ;;  %v2158_v12 = vmax.f32 %v1727_v21, 0.0 }
 0x1c2   :  { %v1541_v59 = vpop.f32.mrf.mxu0  ;;  %v1734_v28 = vpop.f32.mrf.mxu1 }
 0x1c3   :  { %v2159_v39 = vmax.f32 %v1729_v8, 0.0  ;;  %v1733_v56 = vadd.f32 %v1732_v9, %v1540_v13  ;;  %v1542_v26 = vadd.f32 %v1541_v59, %v3712_v31  ;;  %v3911_v51 = vadd.f32 %v2268_v58, %v2267_v47 }
 0x1c4   :  { %v1543_v6 = vpop.f32.mrf.mxu0  ;;  %v1736_v30 = vpop.f32.mrf.mxu1  ;;  %v2270_v24 = vmul.f32 %v3730_v55, %v2158_v12 }
 0x1c5   :  { %v2271_v63 = vmul.f32 %v3725_v43, %v2159_v39  ;;  %v1735_v22 = vadd.f32 %v1734_v28, %v1542_v26  ;;  %v1544_v52 = vadd.f32 %v1543_v6, %v3706_v16  ;;  %v2161_v38 = vmax.f32 %v1733_v56, 0.0 }
 0x1c6   :  { %v1545_v40 = vpop.f32.mrf.mxu0  ;;  %v1738_v41 = vpop.f32.mrf.mxu1 }
 0x1c7   :  { %v2162_v27 = vmax.f32 %v1735_v22, 0.0  ;;  %v1737_v2 = vadd.f32 %v1736_v30, %v1544_v52  ;;  %v1546_v44 = vadd.f32 %v1545_v40, %v3712_v31  ;;  %v3917_v53 = vadd.f32 %v2271_v63, %v2270_v24 }
 0x1c8   :  { %v1549_v61 = vpop.f32.mrf.mxu0  ;;  %v1742_v57 = vpop.f32.mrf.mxu1  ;;  %v2273_v35 = vmul.f32 %v3730_v55, %v2161_v38 }
 0x1c9   :  { %v2274_v54 = vmul.f32 %v3725_v43, %v2162_v27  ;;  %v1739_v32 = vadd.f32 %v1738_v41, %v1546_v44  ;;  %v1550_v34 = vadd.f32 %v1549_v61, %v3706_v16  ;;  %v2164_v21 = vmax.f32 %v1737_v2, 0.0 }
 0x1ca   :  { %v1551_v29 = vpop.f32.mrf.mxu0  ;;  %v1744_v62 = vpop.f32.mrf.mxu1 }
 0x1cb   :  { %v2165_v9 = vmax.f32 %v1739_v32, 0.0  ;;  %v1743_v58 = vadd.f32 %v1742_v57, %v1550_v34  ;;  %v1552_v8 = vadd.f32 %v1551_v29, %v3712_v31  ;;  %v3923_v12 = vadd.f32 %v2274_v54, %v2273_v35 }
 0x1cc   :  { %v1553_v13 = vpop.f32.mrf.mxu0  ;;  %v1746_v47 = vpop.f32.mrf.mxu1  ;;  %v2276_v56 = vmul.f32 %v3730_v55, %v2164_v21 }
 0x1cd   :  { %v2277_v59 = vmul.f32 %v3725_v43, %v2165_v9  ;;  %v1745_v28 = vadd.f32 %v1744_v62, %v1552_v8  ;;  %v1554_v39 = vadd.f32 %v1553_v13, %v3706_v16  ;;  %v2167_v26 = vmax.f32 %v1743_v58, 0.0 }
 0x1ce   :  { %v1555_v6 = vpop.f32.mrf.mxu0  ;;  %v1748_v30 = vpop.f32.mrf.mxu1 }
 0x1cf   :  { %v2168_v63 = vmax.f32 %v1745_v28, 0.0  ;;  %v1747_v22 = vadd.f32 %v1746_v47, %v1554_v39  ;;  %v1556_v52 = vadd.f32 %v1555_v6, %v3712_v31  ;;  %v3929_v40 = vadd.f32 %v2277_v59, %v2276_v56 }
 0x1d0   :  { %v1559_v24 = vpop.f32.mrf.mxu0  ;;  %v1752_v38 = vpop.f32.mrf.mxu1  ;;  %v2279_v44 = vmul.f32 %v3730_v55, %v2167_v26 }
 0x1d1   :  { %v2280_v41 = vmul.f32 %v3725_v43, %v2168_v63  ;;  %v1749_v27 = vadd.f32 %v1748_v30, %v1556_v52  ;;  %v1560_v2 = vadd.f32 %v1559_v24, %v3706_v16  ;;  %v2170_v61 = vmax.f32 %v1747_v22, 0.0 }
 0x1d2   :  { %v1561_v57 = vpop.f32.mrf.mxu0  ;;  %v1754_v54 = vpop.f32.mrf.mxu1 }
 0x1d3   :  { %v2171_v32 = vmax.f32 %v1749_v27, 0.0  ;;  %v1753_v34 = vadd.f32 %v1752_v38, %v1560_v2  ;;  %v1562_v35 = vadd.f32 %v1561_v57, %v3712_v31  ;;  %v3935_v62 = vadd.f32 %v2280_v41, %v2279_v44  ;;  %v4313_v38 = vld [vmem:[#allocation7_spill] sm:$0xff] }
 0x1d4   :  { %v1563_v21 = vpop.f32.mrf.mxu0  ;;  %v1756_v29 = vpop.f32.mrf.mxu1  ;;  %v2282_v13 = vmul.f32 %v3730_v55, %v2170_v61 }
 0x1d5   :  { %v2283_v9 = vmul.f32 %v3725_v43, %v2171_v32  ;;  %v1755_v58 = vadd.f32 %v1754_v54, %v1562_v35  ;;  %v1564_v8 = vadd.f32 %v1563_v21, %v3706_v16  ;;  %v2173_v47 = vmax.f32 %v1753_v34, 0.0 }
 0x1d6   :  { %v1565_v59 = vpop.f32.mrf.mxu0  ;;  %v1758_v28 = vpop.f32.mrf.mxu1  ;;  %v3946_v16 = vrot.slane %v3702_v60, %v4313_v38 }
 0x1d7   :  { %v2174_v39 = vmax.f32 %v1755_v58, 0.0  ;;  %v1757_v56 = vadd.f32 %v1756_v29, %v1564_v8  ;;  %v1566_v26 = vadd.f32 %v1565_v59, %v3712_v31  ;;  %v3941_v63 = vadd.f32 %v2283_v9, %v2282_v13 }
 0x1d8   :  { %v2636_v6 = vpop.f32.mrf.mxu0  ;;  %v2748_v30 = vpop.f32.mrf.mxu1  ;;  %v2285_v41 = vmul.f32 %v3730_v55, %v2173_v47  ;;  %v3956_v8 = vrot.slane %v3720_v17, %v4313_v38 }
 0x1d9   :  { %v2286_v22 = vmul.f32 %v3725_v43, %v2174_v39  ;;  %v2176_v52 = vmax.f32 %v1757_v56, 0.0  ;;  %v1759_v24 = vadd.f32 %v1758_v28, %v1566_v26 }
 0x1da   :  { %v2637_v27 = vpop.f32.mrf.mxu0  ;;  %v2749_v2 = vpop.f32.mrf.mxu1 }
 0x1db   :  { %v2177_v44 = vmax.f32 %v1759_v24, 0.0  ;;  %v2638_v61 = vadd.f32 %v2637_v27, %v2636_v6  ;;  %v3949_v54 = vadd.f32 %v2286_v22, %v2285_v41  ;;  %v2288_v32 = vmul.f32 %v3730_v55, %v2176_v52 }
 0x1dc   :  { %v2639_v57 = vpop.f32.mrf.mxu0  ;;  %v2751_v31 = vpop.f32.mrf.mxu1  ;;  %v2750_v21 = vadd.f32 %v2749_v2, %v2748_v30 }
 0x1dd   :  { %v2289_v34 = vmul.f32 %v3725_v43, %v2177_v44  ;;  %v1796_v35 = vadd.f32 %v2638_v61, %v3946_v16 }
 0x1de   :  { %v2640_v29 = vpop.f32.mrf.mxu0  ;;  %v2752_v60 = vpop.f32.mrf.mxu1 }
 0x1df   :  { %v1957_v9 = vadd.f32 %v2750_v21, %v1796_v35  ;;  %v2641_v58 = vadd.f32 %v2640_v29, %v2639_v57  ;;  %v3958_v13 = vadd.f32 %v2289_v34, %v2288_v32  ;;  %v2753_v39 = vadd.f32 %v2752_v60, %v2751_v31 }
 0x1e0   :  { %v2642_v47 = vpop.f32.mrf.mxu0  ;;  %v2754_v59 = vpop.f32.mrf.mxu1 }
 0x1e1   :  { %v2085_v28 = vmax.f32 %v1957_v9, 0.0  ;;  %v1799_v55 = vadd.f32 %v2641_v58, %v3946_v16 }
 0x1e2   :  { %v2643_v43 = vpop.f32.mrf.mxu0  ;;  %v2755_v56 = vpop.f32.mrf.mxu1 }
 0x1e3   :  { %v1960_v26 = vadd.f32 %v2753_v39, %v1799_v55  ;;  %v2644_v6 = vadd.f32 %v2643_v43, %v2642_v47  ;;  %v2197_v30 = vmul.f32 %v3956_v8, %v2085_v28  ;;  %v2756_v38 = vadd.f32 %v2755_v56, %v2754_v59 }
 0x1e4   :  { %v2645_v22 = vpop.f32.mrf.mxu0  ;;  %v2757_v52 = vpop.f32.mrf.mxu1 }
 0x1e5   :  { %v2088_v24 = vmax.f32 %v1960_v26, 0.0  ;;  %v1804_v17 = vadd.f32 %v2644_v6, %v3946_v16  ;;  %v2292_v41 = vadd.f32 %v3741_v4, %v2197_v30 }
 0x1e6   :  { %v2646_v27 = vpop.f32.mrf.mxu0  ;;  %v2758_v2 = vpop.f32.mrf.mxu1 }
 0x1e7   :  { %v1965_v44 = vadd.f32 %v2756_v38, %v1804_v17  ;;  %v2647_v61 = vadd.f32 %v2646_v27, %v2645_v22  ;;  %2293 = vadd.xlane.f32.xlu0 %v2292_v41  ;;  %v2200_v57 = vmul.f32 %v3956_v8, %v2088_v24  ;;  %v2759_v21 = vadd.f32 %v2758_v2, %v2757_v52 }
 0x1e8   :  { %v2648_v31 = vpop.f32.mrf.mxu0  ;;  %v2760_v32 = vpop.f32.mrf.mxu1 }
 0x1e9   :  { %v2091_v34 = vmax.f32 %v1965_v44, 0.0  ;;  %v1807_v35 = vadd.f32 %v2647_v61, %v3946_v16  ;;  %v2296_v29 = vadd.f32 %v3752_v11, %v2200_v57 }
 0x1ea   :  { %v2649_v60 = vpop.f32.mrf.mxu0  ;;  %v2761_v9 = vpop.f32.mrf.mxu1 }
 0x1eb   :  { %v1968_v58 = vadd.f32 %v2759_v21, %v1807_v35  ;;  %v2650_v47 = vadd.f32 %v2649_v60, %v2648_v31  ;;  %2297 = vadd.xlane.f32.xlu1 %v2296_v29  ;;  %v2203_v4 = vmul.f32 %v3956_v8, %v2091_v34  ;;  %v2762_v43 = vadd.f32 %v2761_v9, %v2760_v32 }
 0x1ec   :  { %v2651_v59 = vpop.f32.mrf.mxu0  ;;  %v2763_v28 = vpop.f32.mrf.mxu1 }
 0x1ed   :  { %v2094_v55 = vmax.f32 %v1968_v58, 0.0  ;;  %v1812_v39 = vadd.f32 %v2650_v47, %v3946_v16  ;;  %v2300_v56 = vadd.f32 %v3757_v37, %v2203_v4 }
 0x1ee   :  { %v2652_v26 = vpop.f32.mrf.mxu0  ;;  %v2764_v6 = vpop.f32.mrf.mxu1 }
 0x1ef   :  { %v1973_v30 = vadd.f32 %v2762_v43, %v1812_v39  ;;  %v2653_v22 = vadd.f32 %v2652_v26, %v2651_v59  ;;  %2301 = vadd.xlane.f32.xlu0 %v2300_v56  ;;  %v2206_v11 = vmul.f32 %v3956_v8, %v2094_v55  ;;  %v2765_v41 = vadd.f32 %v2764_v6, %v2763_v28 }
 0x1f0   :  { %v2654_v52 = vpop.f32.mrf.mxu0  ;;  %v2766_v24 = vpop.f32.mrf.mxu1 }
 0x1f1   :  { %v2097_v17 = vmax.f32 %v1973_v30, 0.0  ;;  %v1815_v38 = vadd.f32 %v2653_v22, %v3946_v16  ;;  %v2304_v27 = vadd.f32 %v3765_v19, %v2206_v11 }
 0x1f2   :  { %v2655_v2 = vpop.f32.mrf.mxu0  ;;  %v2767_v44 = vpop.f32.mrf.mxu1 }
 0x1f3   :  { %v1976_v61 = vadd.f32 %v2765_v41, %v1815_v38  ;;  %v2656_v57 = vadd.f32 %v2655_v2, %v2654_v52  ;;  %2305 = vadd.xlane.f32.xlu0 %v2304_v27  ;;  %v2209_v37 = vmul.f32 %v3956_v8, %v2097_v17  ;;  %v2768_v21 = vadd.f32 %v2767_v44, %v2766_v24 }
 0x1f4   :  { %v2657_v31 = vpop.f32.mrf.mxu0  ;;  %v2769_v32 = vpop.f32.mrf.mxu1 }
 0x1f5   :  { %v2100_v34 = vmax.f32 %v1976_v61, 0.0  ;;  %v1820_v35 = vadd.f32 %v2656_v57, %v3946_v16  ;;  %v2308_v29 = vadd.f32 %v3772_v15, %v2209_v37 }
 0x1f6   :  { %v2658_v60 = vpop.f32.mrf.mxu0  ;;  %v2770_v9 = vpop.f32.mrf.mxu1 }
 0x1f7   :  { %v1981_v58 = vadd.f32 %v2768_v21, %v1820_v35  ;;  %v2659_v47 = vadd.f32 %v2658_v60, %v2657_v31  ;;  %2309 = vadd.xlane.f32.xlu1 %v2308_v29  ;;  %v2212_v19 = vmul.f32 %v3956_v8, %v2100_v34  ;;  %v2771_v39 = vadd.f32 %v2770_v9, %v2769_v32 }
 0x1f8   :  { %v2660_v4 = vpop.f32.mrf.mxu0  ;;  %v2772_v59 = vpop.f32.mrf.mxu1 }
 0x1f9   :  { %v2103_v28 = vmax.f32 %v1981_v58, 0.0  ;;  %v1823_v55 = vadd.f32 %v2659_v47, %v3946_v16  ;;  %v2312_v43 = vadd.f32 %v3782_v42, %v2212_v19 }
 0x1fa   :  { %v2661_v56 = vpop.f32.mrf.mxu0  ;;  %v2773_v26 = vpop.f32.mrf.mxu1 }
 0x1fb   :  { %v1984_v6 = vadd.f32 %v2771_v39, %v1823_v55  ;;  %v2662_v30 = vadd.f32 %v2661_v56, %v2660_v4  ;;  %2313 = vadd.xlane.f32.xlu0 %v2312_v43  ;;  %v2215_v15 = vmul.f32 %v3956_v8, %v2103_v28  ;;  %v2774_v17 = vadd.f32 %v2773_v26, %v2772_v59 }
 0x1fc   :  { %v2663_v22 = vpop.f32.mrf.mxu0  ;;  %v2775_v11 = vpop.f32.mrf.mxu1 }
 0x1fd   :  { %v2106_v52 = vmax.f32 %v1984_v6, 0.0  ;;  %v1828_v24 = vadd.f32 %v2662_v30, %v3946_v16  ;;  %v2316_v38 = vadd.f32 %v3788_v5, %v2215_v15 }
 0x1fe   :  { %v2664_v41 = vpop.f32.mrf.mxu0  ;;  %v2776_v27 = vpop.f32.mrf.mxu1 }
 0x1ff   :  { %v1989_v2 = vadd.f32 %v2774_v17, %v1828_v24  ;;  %v2665_v44 = vadd.f32 %v2664_v41, %v2663_v22  ;;  %2317 = vadd.xlane.f32.xlu1 %v2316_v38  ;;  %v2218_v42 = vmul.f32 %v3956_v8, %v2106_v52  ;;  %v2777_v32 = vadd.f32 %v2776_v27, %v2775_v11 }
 0x200   :  { %v2666_v61 = vpop.f32.mrf.mxu0  ;;  %v2778_v57 = vpop.f32.mrf.mxu1 }
 0x201   :  { %v2109_v37 = vmax.f32 %v1989_v2, 0.0  ;;  %v1831_v31 = vadd.f32 %v2665_v44, %v3946_v16  ;;  %v2320_v34 = vadd.f32 %v3798_v23, %v2218_v42 }
 0x202   :  { %v2667_v35 = vpop.f32.mrf.mxu0  ;;  %v2779_v21 = vpop.f32.mrf.mxu1 }
 0x203   :  { %v1992_v29 = vadd.f32 %v2777_v32, %v1831_v31  ;;  %v2668_v60 = vadd.f32 %v2667_v35, %v2666_v61  ;;  %2321 = vadd.xlane.f32.xlu0 %v2320_v34  ;;  %v2221_v5 = vmul.f32 %v3956_v8, %v2109_v37  ;;  %v2780_v4 = vadd.f32 %v2779_v21, %v2778_v57 }
 0x204   :  { %v2669_v9 = vpop.f32.mrf.mxu0  ;;  %v2781_v58 = vpop.f32.mrf.mxu1 }
 0x205   :  { %v2112_v47 = vmax.f32 %v1992_v29, 0.0  ;;  %v1836_v19 = vadd.f32 %v2668_v60, %v3946_v16  ;;  %v2324_v59 = vadd.f32 %v3806_v1, %v2221_v5 }
 0x206   :  { %v2670_v28 = vpop.f32.mrf.mxu0  ;;  %v2782_v55 = vpop.f32.mrf.mxu1 }
 0x207   :  { %v1997_v39 = vadd.f32 %v2780_v4, %v1836_v19  ;;  %v2671_v43 = vadd.f32 %v2670_v28, %v2669_v9  ;;  %2325 = vadd.xlane.f32.xlu1 %v2324_v59  ;;  %v2224_v23 = vmul.f32 %v3956_v8, %v2112_v47  ;;  %v2783_v15 = vadd.f32 %v2782_v55, %v2781_v58 }
 0x208   :  { %v2672_v56 = vpop.f32.mrf.mxu0  ;;  %v2784_v26 = vpop.f32.mrf.mxu1 }
 0x209   :  { %v2115_v6 = vmax.f32 %v1997_v39, 0.0  ;;  %v1839_v30 = vadd.f32 %v2671_v43, %v3946_v16  ;;  %v2328_v22 = vadd.f32 %v3814_v25, %v2224_v23 }
 0x20a   :  { %v2673_v11 = vpop.f32.mrf.mxu0  ;;  %v2785_v52 = vpop.f32.mrf.mxu1 }
 0x20b   :  { %v2000_v24 = vadd.f32 %v2783_v15, %v1839_v30  ;;  %v2674_v17 = vadd.f32 %v2673_v11, %v2672_v56  ;;  %2329 = vadd.xlane.f32.xlu0 %v2328_v22  ;;  %v2227_v1 = vmul.f32 %v3956_v8, %v2115_v6  ;;  %v2786_v44 = vadd.f32 %v2785_v52, %v2784_v26 }
 0x20c   :  { %v2675_v38 = vpop.f32.mrf.mxu0  ;;  %v2787_v41 = vpop.f32.mrf.mxu1 }
 0x20d   :  { %v2118_v27 = vmax.f32 %v2000_v24, 0.0  ;;  %v1844_v2 = vadd.f32 %v2674_v17, %v3946_v16  ;;  %v2332_v42 = vadd.f32 %v3824_v0, %v2227_v1 }
 0x20e   :  { %v2676_v61 = vpop.f32.mrf.mxu0  ;;  %v2788_v57 = vpop.f32.mrf.mxu1 }
 0x20f   :  { %v2005_v37 = vadd.f32 %v2786_v44, %v1844_v2  ;;  %v2677_v31 = vadd.f32 %v2676_v61, %v2675_v38  ;;  %2333 = vadd.xlane.f32.xlu1 %v2332_v42  ;;  %v2230_v25 = vmul.f32 %v3956_v8, %v2118_v27  ;;  %v2789_v29 = vadd.f32 %v2788_v57, %v2787_v41 }
 0x210   :  { %v2678_v32 = vpop.f32.mrf.mxu0  ;;  %v2790_v34 = vpop.f32.mrf.mxu1 }
 0x211   :  { %v2121_v35 = vmax.f32 %v2005_v37, 0.0  ;;  %v1847_v21 = vadd.f32 %v2677_v31, %v3946_v16  ;;  %v2336_v60 = vadd.f32 %v3830_v3, %v2230_v25 }
 0x212   :  { %v2679_v5 = vpop.f32.mrf.mxu0  ;;  %v2791_v9 = vpop.f32.mrf.mxu1 }
 0x213   :  { %v2008_v58 = vadd.f32 %v2789_v29, %v1847_v21  ;;  %v2680_v47 = vadd.f32 %v2679_v5, %v2678_v32  ;;  %2337 = vadd.xlane.f32.xlu0 %v2336_v60  ;;  %v2233_v0 = vmul.f32 %v3956_v8, %v2121_v35  ;;  %v2792_v55 = vadd.f32 %v2791_v9, %v2790_v34 }
 0x214   :  { %v2681_v19 = vpop.f32.mrf.mxu0  ;;  %v2793_v4 = vpop.f32.mrf.mxu1 }
 0x215   :  { %v2124_v59 = vmax.f32 %v2008_v58, 0.0  ;;  %v1852_v28 = vadd.f32 %v2680_v47, %v3946_v16  ;;  %v2340_v39 = vadd.f32 %v3839_v50, %v2233_v0 }
 0x216   :  { %v2682_v43 = vpop.f32.mrf.mxu0  ;;  %v2794_v23 = vpop.f32.mrf.mxu1 }
 0x217   :  { %v2013_v56 = vadd.f32 %v2792_v55, %v1852_v28  ;;  %v2683_v26 = vadd.f32 %v2682_v43, %v2681_v19  ;;  %2341 = vadd.xlane.f32.xlu1 %v2340_v39  ;;  %v2236_v3 = vmul.f32 %v3956_v8, %v2124_v59  ;;  %v2795_v11 = vadd.f32 %v2794_v23, %v2793_v4 }
 0x218   :  { %v2684_v6 = vpop.f32.mrf.mxu0  ;;  %v2796_v30 = vpop.f32.mrf.mxu1 }
 0x219   :  { %v2127_v15 = vmax.f32 %v2013_v56, 0.0  ;;  %v1855_v22 = vadd.f32 %v2683_v26, %v3946_v16  ;;  %v2344_v52 = vadd.f32 %v3845_v33, %v2236_v3 }
 0x21a   :  { %v2685_v24 = vpop.f32.mrf.mxu0  ;;  %v2797_v17 = vpop.f32.mrf.mxu1 }
 0x21b   :  { %v2016_v1 = vadd.f32 %v2795_v11, %v1855_v22  ;;  %v2686_v38 = vadd.f32 %v2685_v24, %v2684_v6  ;;  %2345 = vadd.xlane.f32.xlu0 %v2344_v52  ;;  %v2239_v50 = vmul.f32 %v3956_v8, %v2127_v15  ;;  %v2798_v42 = vadd.f32 %v2797_v17, %v2796_v30 }
 0x21c   :  { %v2687_v41 = vpop.f32.mrf.mxu0  ;;  %v2799_v27 = vpop.f32.mrf.mxu1 }
 0x21d   :  { %v2130_v2 = vmax.f32 %v2016_v1, 0.0  ;;  %v1860_v44 = vadd.f32 %v2686_v38, %v3946_v16  ;;  %v2348_v61 = vadd.f32 %v3851_v18, %v2239_v50 }
 0x21e   :  { %v2688_v57 = vpop.f32.mrf.mxu0  ;;  %v2800_v37 = vpop.f32.mrf.mxu1 }
 0x21f   :  { %v2021_v31 = vadd.f32 %v2798_v42, %v1860_v44  ;;  %v2689_v25 = vadd.f32 %v2688_v57, %v2687_v41  ;;  %2349 = vadd.xlane.f32.xlu1 %v2348_v61  ;;  %v2242_v33 = vmul.f32 %v3956_v8, %v2130_v2  ;;  %v2801_v29 = vadd.f32 %v2800_v37, %v2799_v27 }
 0x220   :  { %v2690_v32 = vpop.f32.mrf.mxu0  ;;  %v2802_v34 = vpop.f32.mrf.mxu1 }
 0x221   :  { %v2133_v35 = vmax.f32 %v2021_v31, 0.0  ;;  %v1863_v21 = vadd.f32 %v2689_v25, %v3946_v16  ;;  %v2352_v60 = vadd.f32 %v3857_v49, %v2242_v33 }
 0x222   :  { %v2691_v5 = vpop.f32.mrf.mxu0  ;;  %v2803_v9 = vpop.f32.mrf.mxu1 }
 0x223   :  { %v2024_v58 = vadd.f32 %v2801_v29, %v1863_v21  ;;  %v2692_v47 = vadd.f32 %v2691_v5, %v2690_v32  ;;  %2353 = vadd.xlane.f32.xlu0 %v2352_v60  ;;  %v2245_v18 = vmul.f32 %v3956_v8, %v2133_v35  ;;  %v2804_v28 = vadd.f32 %v2803_v9, %v2802_v34 }
 0x224   :  { %v2693_v0 = vpop.f32.mrf.mxu0  ;;  %v2805_v19 = vpop.f32.mrf.mxu1 }
 0x225   :  { %v2136_v4 = vmax.f32 %v2024_v58, 0.0  ;;  %v1868_v59 = vadd.f32 %v2692_v47, %v3946_v16  ;;  %v2356_v55 = vadd.f32 %v3863_v20, %v2245_v18 }
 0x226   :  { %v2694_v39 = vpop.f32.mrf.mxu0  ;;  %v2806_v43 = vpop.f32.mrf.mxu1 }
 0x227   :  { %v2029_v23 = vadd.f32 %v2804_v28, %v1868_v59  ;;  %v2695_v56 = vadd.f32 %v2694_v39, %v2693_v0  ;;  %2357 = vadd.xlane.f32.xlu1 %v2356_v55  ;;  %v2248_v49 = vmul.f32 %v3956_v8, %v2136_v4  ;;  %v2807_v15 = vadd.f32 %v2806_v43, %v2805_v19 }
 0x228   :  { %v2696_v26 = vpop.f32.mrf.mxu0  ;;  %v2808_v3 = vpop.f32.mrf.mxu1 }
 0x229   :  { %v2139_v6 = vmax.f32 %v2029_v23, 0.0  ;;  %v1871_v30 = vadd.f32 %v2695_v56, %v3946_v16  ;;  %v2360_v22 = vadd.f32 %v3869_v36, %v2248_v49 }
 0x22a   :  { %v2697_v11 = vpop.f32.mrf.mxu0  ;;  %v2809_v52 = vpop.f32.mrf.mxu1 }
 0x22b   :  { %v2032_v24 = vadd.f32 %v2807_v15, %v1871_v30  ;;  %v2698_v17 = vadd.f32 %v2697_v11, %v2696_v26  ;;  %2361 = vadd.xlane.f32.xlu0 %v2360_v22  ;;  %v2251_v20 = vmul.f32 %v3956_v8, %v2139_v6  ;;  %v2810_v27 = vadd.f32 %v2809_v52, %v2808_v3 }
 0x22c   :  { %v2699_v1 = vpop.f32.mrf.mxu0  ;;  %v2811_v38 = vpop.f32.mrf.mxu1 }
 0x22d   :  { %v2142_v50 = vmax.f32 %v2032_v24, 0.0  ;;  %v1876_v41 = vadd.f32 %v2698_v17, %v3946_v16  ;;  %v2364_v2 = vadd.f32 %v3875_v48, %v2251_v20 }
 0x22e   :  { %v2700_v44 = vpop.f32.mrf.mxu0  ;;  %v2812_v42 = vpop.f32.mrf.mxu1 }
 0x22f   :  { %v2037_v61 = vadd.f32 %v2810_v27, %v1876_v41  ;;  %v2701_v57 = vadd.f32 %v2700_v44, %v2699_v1  ;;  %2365 = vadd.xlane.f32.xlu1 %v2364_v2  ;;  %v2254_v36 = vmul.f32 %v3956_v8, %v2142_v50  ;;  %v2813_v32 = vadd.f32 %v2812_v42, %v2811_v38 }
 0x230   :  { %v2702_v37 = vpop.f32.mrf.mxu0  ;;  %v2814_v31 = vpop.f32.mrf.mxu1 }
 0x231   :  { %v2145_v25 = vmax.f32 %v2037_v61, 0.0  ;;  %v1879_v33 = vadd.f32 %v2701_v57, %v3946_v16  ;;  %v2368_v34 = vadd.f32 %v3881_v45, %v2254_v36 }
 0x232   :  { %v2703_v35 = vpop.f32.mrf.mxu0  ;;  %v2815_v21 = vpop.f32.mrf.mxu1 }
 0x233   :  { %v2040_v29 = vadd.f32 %v2813_v32, %v1879_v33  ;;  %v2704_v60 = vadd.f32 %v2703_v35, %v2702_v37  ;;  %2369 = vadd.xlane.f32.xlu0 %v2368_v34  ;;  %v2257_v48 = vmul.f32 %v3956_v8, %v2145_v25  ;;  %v2816_v18 = vadd.f32 %v2815_v21, %v2814_v31 }
 0x234   :  { %v2705_v5 = vpop.f32.mrf.mxu0  ;;  %v2817_v9 = vpop.f32.mrf.mxu1 }
 0x235   :  { %v2148_v58 = vmax.f32 %v2040_v29, 0.0  ;;  %v1884_v47 = vadd.f32 %v2704_v60, %v3946_v16  ;;  %v2372_v0 = vadd.f32 %v3887_v14, %v2257_v48 }
 0x236   :  { %v2706_v19 = vpop.f32.mrf.mxu0  ;;  %v2818_v4 = vpop.f32.mrf.mxu1 }
 0x237   :  { %v2045_v59 = vadd.f32 %v2816_v18, %v1884_v47  ;;  %v2707_v28 = vadd.f32 %v2706_v19, %v2705_v5  ;;  %2373 = vadd.xlane.f32.xlu1 %v2372_v0  ;;  %v2260_v45 = vmul.f32 %v3956_v8, %v2148_v58  ;;  %v2819_v56 = vadd.f32 %v2818_v4, %v2817_v9 }
 0x238   :  { %v2708_v55 = vpop.f32.mrf.mxu0  ;;  %v2820_v39 = vpop.f32.mrf.mxu1 }
 0x239   :  { %v2151_v43 = vmax.f32 %v2045_v59, 0.0  ;;  %v1887_v23 = vadd.f32 %v2707_v28, %v3946_v16  ;;  %v2376_v49 = vadd.f32 %v3893_v46, %v2260_v45 }
 0x23a   :  { %v2709_v26 = vpop.f32.mrf.mxu0  ;;  %v2821_v3 = vpop.f32.mrf.mxu1 }
 0x23b   :  { %v2048_v6 = vadd.f32 %v2819_v56, %v1887_v23  ;;  %v2710_v30 = vadd.f32 %v2709_v26, %v2708_v55  ;;  %2377 = vadd.xlane.f32.xlu0 %v2376_v49  ;;  %v2263_v14 = vmul.f32 %v3956_v8, %v2151_v43  ;;  %v2822_v24 = vadd.f32 %v2821_v3, %v2820_v39 }
 0x23c   :  { %v2711_v15 = vpop.f32.mrf.mxu0  ;;  %v2823_v22 = vpop.f32.mrf.mxu1 }
 0x23d   :  { %v2154_v11 = vmax.f32 %v2048_v6, 0.0  ;;  %v1892_v52 = vadd.f32 %v2710_v30, %v3946_v16  ;;  %v2380_v17 = vadd.f32 %v3899_v10, %v2263_v14 }
 0x23e   :  { %v2712_v20 = vpop.f32.mrf.mxu0  ;;  %v2824_v1 = vpop.f32.mrf.mxu1 }
 0x23f   :  { %v2053_v38 = vadd.f32 %v2822_v24, %v1892_v52  ;;  %v2713_v50 = vadd.f32 %v2712_v20, %v2711_v15  ;;  %2381 = vadd.xlane.f32.xlu1 %v2380_v17  ;;  %v2266_v46 = vmul.f32 %v3956_v8, %v2154_v11  ;;  %v2825_v42 = vadd.f32 %v2824_v1, %v2823_v22 }
 0x240   :  { %v2714_v41 = vpop.f32.mrf.mxu0  ;;  %v2826_v27 = vpop.f32.mrf.mxu1 }
 0x241   :  { %v2157_v2 = vmax.f32 %v2053_v38, 0.0  ;;  %v1895_v44 = vadd.f32 %v2713_v50, %v3946_v16  ;;  %v2384_v61 = vadd.f32 %v3905_v7, %v2266_v46 }
 0x242   :  { %v2715_v57 = vpop.f32.mrf.mxu0  ;;  %v2827_v36 = vpop.f32.mrf.mxu1 }
 0x243   :  { %v2056_v37 = vadd.f32 %v2825_v42, %v1895_v44  ;;  %v2716_v31 = vadd.f32 %v2715_v57, %v2714_v41  ;;  %2385 = vadd.xlane.f32.xlu0 %v2384_v61  ;;  %v2269_v10 = vmul.f32 %v3956_v8, %v2157_v2  ;;  %v2828_v35 = vadd.f32 %v2827_v36, %v2826_v27 }
 0x244   :  { %v2717_v25 = vpop.f32.mrf.mxu0  ;;  %v2829_v33 = vpop.f32.mrf.mxu1 }
 0x245   :  { %v2160_v32 = vmax.f32 %v2056_v37, 0.0  ;;  %v1900_v34 = vadd.f32 %v2716_v31, %v3946_v16  ;;  %v2388_v21 = vadd.f32 %v3911_v51, %v2269_v10 }
 0x246   :  { %v2718_v29 = vpop.f32.mrf.mxu0  ;;  %v2830_v60 = vpop.f32.mrf.mxu1 }
 0x247   :  { %v2061_v48 = vadd.f32 %v2828_v35, %v1900_v34  ;;  %v2719_v5 = vadd.f32 %v2718_v29, %v2717_v25  ;;  %2389 = vadd.xlane.f32.xlu1 %v2388_v21  ;;  %v2272_v7 = vmul.f32 %v3956_v8, %v2160_v32  ;;  %v2831_v0 = vadd.f32 %v2830_v60, %v2829_v33 }
 0x248   :  { %v2720_v9 = vpop.f32.mrf.mxu0  ;;  %v2832_v58 = vpop.f32.mrf.mxu1 }
 0x249   :  { %v2163_v47 = vmax.f32 %v2061_v48, 0.0  ;;  %v1903_v18 = vadd.f32 %v2719_v5, %v3946_v16  ;;  %v2392_v19 = vadd.f32 %v3917_v53, %v2272_v7 }
 0x24a   :  { %v2721_v4 = vpop.f32.mrf.mxu0  ;;  %v2833_v59 = vpop.f32.mrf.mxu1 }
 0x24b   :  { %v2064_v28 = vadd.f32 %v2831_v0, %v1903_v18  ;;  %v2722_v45 = vadd.f32 %v2721_v4, %v2720_v9  ;;  %2393 = vadd.xlane.f32.xlu0 %v2392_v19  ;;  %v2275_v51 = vmul.f32 %v3956_v8, %v2163_v47  ;;  %v2834_v56 = vadd.f32 %v2833_v59, %v2832_v58 }
 0x24c   :  { %v2723_v55 = vpop.f32.mrf.mxu0  ;;  %v2835_v39 = vpop.f32.mrf.mxu1 }
 0x24d   :  { %v2166_v43 = vmax.f32 %v2064_v28, 0.0  ;;  %v1908_v23 = vadd.f32 %v2722_v45, %v3946_v16  ;;  %v2396_v49 = vadd.f32 %v3923_v12, %v2275_v51 }
 0x24e   :  { %v2724_v26 = vpop.f32.mrf.mxu0  ;;  %v2836_v3 = vpop.f32.mrf.mxu1 }
 0x24f   :  { %v2069_v6 = vadd.f32 %v2834_v56, %v1908_v23  ;;  %v2725_v30 = vadd.f32 %v2724_v26, %v2723_v55  ;;  %2397 = vadd.xlane.f32.xlu1 %v2396_v49  ;;  %v2278_v53 = vmul.f32 %v3956_v8, %v2166_v43  ;;  %v2837_v52 = vadd.f32 %v2836_v3, %v2835_v39 }
 0x250   :  { %v2726_v14 = vpop.f32.mrf.mxu0  ;;  %v2838_v15 = vpop.f32.mrf.mxu1 }
 0x251   :  { %v2169_v22 = vmax.f32 %v2069_v6, 0.0  ;;  %v1911_v11 = vadd.f32 %v2725_v30, %v3946_v16  ;;  %v2400_v24 = vadd.f32 %v3929_v40, %v2278_v53 }
 0x252   :  { %v2727_v17 = vpop.f32.mrf.mxu0  ;;  %v2839_v20 = vpop.f32.mrf.mxu1 }
 0x253   :  { %v2072_v1 = vadd.f32 %v2837_v52, %v1911_v11  ;;  %v2728_v38 = vadd.f32 %v2727_v17, %v2726_v14  ;;  %2401 = vadd.xlane.f32.xlu0 %v2400_v24  ;;  %v2281_v12 = vmul.f32 %v3956_v8, %v2169_v22  ;;  %v2840_v2 = vadd.f32 %v2839_v20, %v2838_v15 }
 0x254   :  { %v2729_v50 = vpop.f32.mrf.mxu0  ;;  %v2841_v46 = vpop.f32.mrf.mxu1 }
 0x255   :  { %v2172_v41 = vmax.f32 %v2072_v1, 0.0  ;;  %v1916_v27 = vadd.f32 %v2728_v38, %v3946_v16  ;;  %v2404_v44 = vadd.f32 %v3935_v62, %v2281_v12 }
 0x256   :  { %v2730_v42 = vpop.f32.mrf.mxu0  ;;  %v2842_v61 = vpop.f32.mrf.mxu1 }
 0x257   :  { %v2077_v57 = vadd.f32 %v2840_v2, %v1916_v27  ;;  %v2731_v36 = vadd.f32 %v2730_v42, %v2729_v50  ;;  %2405 = vadd.xlane.f32.xlu1 %v2404_v44  ;;  %v2284_v40 = vmul.f32 %v3956_v8, %v2172_v41  ;;  %v2843_v10 = vadd.f32 %v2842_v61, %v2841_v46 }
 0x259   :  { %v2175_v37 = vmax.f32 %v2077_v57, 0.0  ;;  %v1919_v31 = vadd.f32 %v2731_v36, %v3946_v16  ;;  %v2408_v25 = vadd.f32 %v3941_v63, %v2284_v40  ;;  %v4058_v16 = vld [vmem:[%s4221_s1 + $0x4] ss:$0 sm:$0xff] }
 0x25b   :  { %v2080_v33 = vadd.f32 %v2843_v10, %v1919_v31  ;;  %2409 = vadd.xlane.f32.xlu0 %v2408_v25  ;;  %v2287_v32 = vmul.f32 %v3956_v8, %v2175_v37 }
 0x25d   :  { %v2178_v34 = vmax.f32 %v2080_v33, 0.0  ;;  %v2412_v62 = vadd.f32 %v3949_v54, %v2287_v32 }
 0x25f   :  { %2413 = vadd.xlane.f32.xlu1 %v2412_v62  ;;  %v2290_v35 = vmul.f32 %v3956_v8, %v2178_v34 }
 0x261   :  { %v2416_v21 = vadd.f32 %v3958_v13, %v2290_v35 }
 0x263   :  { %2417 = vadd.xlane.f32.xlu0 %v2416_v21 }
 0x270   :  { %v2294_v29 = vpop.xlane.xlu0 %2293 }
 0x271   :  { %v2419_v63 = vadd.f32 %v2294_v29, %v4058_v16 }
 0x273   :  { %2978 = vtanh.f32 %v2419_v63 }
 0x274   :  { %v2298_v60 = vpop.xlane.xlu1 %2297 }
 0x275   :  { %v2420_v48 = vadd.f32 %v2298_v60, %v4058_v16 }
 0x277   :  { %2980 = vtanh.f32 %v2420_v48 }
 0x278   :  { %v2302_v54 = vpop.xlane.xlu0 %2301 }
 0x279   :  { %v2421_v5 = vadd.f32 %v2302_v54, %v4058_v16 }
 0x27b   :  { %2982 = vtanh.f32 %v2421_v5 }
 0x27c   :  { %v2306_v8 = vpop.xlane.xlu0 %2305 }
 0x27d   :  { %v2422_v13 = vadd.f32 %v2306_v8, %v4058_v16 }
 0x27f   :  { %2984 = vtanh.f32 %v2422_v13 }
 0x280   :  { %v2979_v7 = vpop.eup %2978  ;;  %v2310_v9 = vpop.xlane.xlu1 %2309 }
 0x281   :  { %2484 = vst.msk [vmem:[%s4223_s3] sm:$0xff] %vm2483_vm0, %v2979_v7  ;;  %v2423_v58 = vadd.f32 %v2310_v9, %v4058_v16 }
 0x283   :  { %2986 = vtanh.f32 %v2423_v58 }
 0x284   :  { %v2981_v47 = vpop.eup %2980  ;;  %v2314_v18 = vpop.xlane.xlu0 %2313 }
 0x285   :  { %2485 = vst.msk [vmem:[%s4223_s3 + $0x8] sm:$0xff] %vm2483_vm0, %v2981_v47  ;;  %v2424_v0 = vadd.f32 %v2314_v18, %v4058_v16 }
 0x287   :  { %2988 = vtanh.f32 %v2424_v0 }
 0x288   :  { %v2983_v19 = vpop.eup %2982  ;;  %v2318_v4 = vpop.xlane.xlu1 %2317 }
 0x289   :  { %2486 = vst.msk [vmem:[%s4223_s3 + $0x10] sm:$0xff] %vm2483_vm0, %v2983_v19  ;;  %v2425_v59 = vadd.f32 %v2318_v4, %v4058_v16 }
 0x28b   :  { %2990 = vtanh.f32 %v2425_v59 }
 0x28c   :  { %v2985_v28 = vpop.eup %2984  ;;  %v2322_v45 = vpop.xlane.xlu0 %2321 }
 0x28d   :  { %2487 = vst.msk [vmem:[%s4223_s3 + $0x18] sm:$0xff] %vm2483_vm0, %v2985_v28  ;;  %v2426_v51 = vadd.f32 %v2322_v45, %v4058_v16 }
 0x28f   :  { %2992 = vtanh.f32 %v2426_v51 }
 0x290   :  { %v2987_v55 = vpop.eup %2986  ;;  %v2326_v39 = vpop.xlane.xlu1 %2325 }
 0x291   :  { %2488 = vst.msk [vmem:[%s4223_s3 + $0x20] sm:$0xff] %vm2483_vm0, %v2987_v55  ;;  %v2427_v43 = vadd.f32 %v2326_v39, %v4058_v16 }
 0x293   :  { %2994 = vtanh.f32 %v2427_v43 }
 0x294   :  { %v2989_v23 = vpop.eup %2988  ;;  %v2330_v56 = vpop.xlane.xlu0 %2329 }
 0x295   :  { %2489 = vst.msk [vmem:[%s4223_s3 + $0x28] sm:$0xff] %vm2483_vm0, %v2989_v23  ;;  %v2428_v49 = vadd.f32 %v2330_v56, %v4058_v16 }
 0x297   :  { %2996 = vtanh.f32 %v2428_v49 }
 0x298   :  { %v2991_v26 = vpop.eup %2990  ;;  %v2334_v3 = vpop.xlane.xlu1 %2333 }
 0x299   :  { %2490 = vst.msk [vmem:[%s4223_s3 + $0x30] sm:$0xff] %vm2483_vm0, %v2991_v26  ;;  %v2429_v6 = vadd.f32 %v2334_v3, %v4058_v16 }
 0x29b   :  { %2998 = vtanh.f32 %v2429_v6 }
 0x29c   :  { %v2993_v30 = vpop.eup %2992  ;;  %v2338_v53 = vpop.xlane.xlu0 %2337 }
 0x29d   :  { %2491 = vst.msk [vmem:[%s4223_s3 + $0x38] sm:$0xff] %vm2483_vm0, %v2993_v30  ;;  %v2430_v14 = vadd.f32 %v2338_v53, %v4058_v16 }
 0x29f   :  { %3000 = vtanh.f32 %v2430_v14 }
 0x2a0   :  { %v2995_v15 = vpop.eup %2994  ;;  %v2342_v22 = vpop.xlane.xlu1 %2341 }
 0x2a1   :  { %2492 = vst.msk [vmem:[%s4223_s3 + $0x40] sm:$0xff] %vm2483_vm0, %v2995_v15  ;;  %v2431_v11 = vadd.f32 %v2342_v22, %v4058_v16 }
 0x2a3   :  { %3002 = vtanh.f32 %v2431_v11 }
 0x2a4   :  { %v2997_v52 = vpop.eup %2996  ;;  %v2346_v24 = vpop.xlane.xlu0 %2345 }
 0x2a5   :  { %2493 = vst.msk [vmem:[%s4223_s3 + $0x48] sm:$0xff] %vm2483_vm0, %v2997_v52  ;;  %v2432_v17 = vadd.f32 %v2346_v24, %v4058_v16 }
 0x2a7   :  { %3004 = vtanh.f32 %v2432_v17 }
 0x2a8   :  { %v2999_v20 = vpop.eup %2998  ;;  %v2350_v1 = vpop.xlane.xlu1 %2349 }
 0x2a9   :  { %2494 = vst.msk [vmem:[%s4223_s3 + $0x50] sm:$0xff] %vm2483_vm0, %v2999_v20  ;;  %v2433_v38 = vadd.f32 %v2350_v1, %v4058_v16 }
 0x2ab   :  { %3006 = vtanh.f32 %v2433_v38 }
 0x2ac   :  { %v3001_v12 = vpop.eup %3000  ;;  %v2354_v50 = vpop.xlane.xlu0 %2353 }
 0x2ad   :  { %2495 = vst.msk [vmem:[%s4223_s3 + $0x58] sm:$0xff] %vm2483_vm0, %v3001_v12  ;;  %v2434_v46 = vadd.f32 %v2354_v50, %v4058_v16 }
 0x2af   :  { %3008 = vtanh.f32 %v2434_v46 }
 0x2b0   :  { %v3003_v41 = vpop.eup %3002  ;;  %v2358_v27 = vpop.xlane.xlu1 %2357 }
 0x2b1   :  { %2496 = vst.msk [vmem:[%s4223_s3 + $0x60] sm:$0xff] %vm2483_vm0, %v3003_v41  ;;  %v2435_v2 = vadd.f32 %v2358_v27, %v4058_v16 }
 0x2b3   :  { %3010 = vtanh.f32 %v2435_v2 }
 0x2b4   :  { %v3005_v44 = vpop.eup %3004  ;;  %v2362_v42 = vpop.xlane.xlu0 %2361 }
 0x2b5   :  { %2497 = vst.msk [vmem:[%s4223_s3 + $0x68] sm:$0xff] %vm2483_vm0, %v3005_v44  ;;  %v2436_v61 = vadd.f32 %v2362_v42, %v4058_v16 }
 0x2b7   :  { %3012 = vtanh.f32 %v2436_v61 }
 0x2b8   :  { %v3007_v57 = vpop.eup %3006  ;;  %v2366_v36 = vpop.xlane.xlu1 %2365 }
 0x2b9   :  { %2498 = vst.msk [vmem:[%s4223_s3 + $0x70] sm:$0xff] %vm2483_vm0, %v3007_v57  ;;  %v2437_v40 = vadd.f32 %v2366_v36, %v4058_v16 }
 0x2bb   :  { %3014 = vtanh.f32 %v2437_v40 }
 0x2bc   :  { %v3009_v37 = vpop.eup %3008  ;;  %v2370_v31 = vpop.xlane.xlu0 %2369 }
 0x2bd   :  { %2499 = vst.msk [vmem:[%s4223_s3 + $0x78] sm:$0xff] %vm2483_vm0, %v3009_v37  ;;  %v2438_v10 = vadd.f32 %v2370_v31, %v4058_v16 }
 0x2bf   :  { %3016 = vtanh.f32 %v2438_v10 }
 0x2c0   :  { %v3011_v25 = vpop.eup %3010  ;;  %v2374_v33 = vpop.xlane.xlu1 %2373 }
 0x2c1   :  { %2500 = vst.msk [vmem:[%s4223_s3 + $0x80] sm:$0xff] %vm2483_vm0, %v3011_v25  ;;  %v2439_v32 = vadd.f32 %v2374_v33, %v4058_v16 }
 0x2c3   :  { %3018 = vtanh.f32 %v2439_v32 }
 0x2c4   :  { %v3013_v34 = vpop.eup %3012  ;;  %v2378_v62 = vpop.xlane.xlu0 %2377 }
 0x2c5   :  { %2501 = vst.msk [vmem:[%s4223_s3 + $0x88] sm:$0xff] %vm2483_vm0, %v3013_v34  ;;  %v2440_v35 = vadd.f32 %v2378_v62, %v4058_v16 }
 0x2c7   :  { %3020 = vtanh.f32 %v2440_v35 }
 0x2c8   :  { %v3015_v21 = vpop.eup %3014  ;;  %v2382_v29 = vpop.xlane.xlu1 %2381 }
 0x2c9   :  { %2502 = vst.msk [vmem:[%s4223_s3 + $0x90] sm:$0xff] %vm2483_vm0, %v3015_v21  ;;  %v2441_v63 = vadd.f32 %v2382_v29, %v4058_v16 }
 0x2cb   :  { %3022 = vtanh.f32 %v2441_v63 }
 0x2cc   :  { %v3017_v60 = vpop.eup %3016  ;;  %v2386_v48 = vpop.xlane.xlu0 %2385 }
 0x2cd   :  { %2503 = vst.msk [vmem:[%s4223_s3 + $0x98] sm:$0xff] %vm2483_vm0, %v3017_v60  ;;  %v2442_v54 = vadd.f32 %v2386_v48, %v4058_v16 }
 0x2cf   :  { %3024 = vtanh.f32 %v2442_v54 }
 0x2d0   :  { %v3019_v5 = vpop.eup %3018  ;;  %v2390_v8 = vpop.xlane.xlu1 %2389 }
 0x2d1   :  { %2504 = vst.msk [vmem:[%s4223_s3 + $0xa0] sm:$0xff] %vm2483_vm0, %v3019_v5  ;;  %v2443_v13 = vadd.f32 %v2390_v8, %v4058_v16 }
 0x2d3   :  { %3026 = vtanh.f32 %v2443_v13 }
 0x2d4   :  { %v3021_v7 = vpop.eup %3020  ;;  %v2394_v9 = vpop.xlane.xlu0 %2393 }
 0x2d5   :  { %2505 = vst.msk [vmem:[%s4223_s3 + $0xa8] sm:$0xff] %vm2483_vm0, %v3021_v7  ;;  %v2444_v58 = vadd.f32 %v2394_v9, %v4058_v16 }
 0x2d7   :  { %3028 = vtanh.f32 %v2444_v58 }
 0x2d8   :  { %v3023_v47 = vpop.eup %3022  ;;  %v2398_v18 = vpop.xlane.xlu1 %2397 }
 0x2d9   :  { %2506 = vst.msk [vmem:[%s4223_s3 + $0xb0] sm:$0xff] %vm2483_vm0, %v3023_v47  ;;  %v2445_v0 = vadd.f32 %v2398_v18, %v4058_v16 }
 0x2db   :  { %3030 = vtanh.f32 %v2445_v0 }
 0x2dc   :  { %v3025_v19 = vpop.eup %3024  ;;  %v2402_v4 = vpop.xlane.xlu0 %2401 }
 0x2dd   :  { %2507 = vst.msk [vmem:[%s4223_s3 + $0xb8] sm:$0xff] %vm2483_vm0, %v3025_v19  ;;  %v2446_v59 = vadd.f32 %v2402_v4, %v4058_v16 }
 0x2df   :  { %3032 = vtanh.f32 %v2446_v59 }
 0x2e0   :  { %v3027_v28 = vpop.eup %3026  ;;  %v2406_v45 = vpop.xlane.xlu1 %2405 }
 0x2e1   :  { %2508 = vst.msk [vmem:[%s4223_s3 + $0xc0] sm:$0xff] %vm2483_vm0, %v3027_v28  ;;  %v2447_v51 = vadd.f32 %v2406_v45, %v4058_v16 }
 0x2e3   :  { %3034 = vtanh.f32 %v2447_v51 }
 0x2e4   :  { %v3029_v55 = vpop.eup %3028  ;;  %v2410_v39 = vpop.xlane.xlu0 %2409 }
 0x2e5   :  { %2509 = vst.msk [vmem:[%s4223_s3 + $0xc8] sm:$0xff] %vm2483_vm0, %v3029_v55  ;;  %v2448_v43 = vadd.f32 %v2410_v39, %v4058_v16 }
 0x2e7   :  { %3036 = vtanh.f32 %v2448_v43 }
 0x2e8   :  { %v3031_v23 = vpop.eup %3030  ;;  %v2414_v56 = vpop.xlane.xlu1 %2413 }
 0x2e9   :  { %2510 = vst.msk [vmem:[%s4223_s3 + $0xd0] sm:$0xff] %vm2483_vm0, %v3031_v23  ;;  %v2449_v49 = vadd.f32 %v2414_v56, %v4058_v16 }
 0x2eb   :  { %3038 = vtanh.f32 %v2449_v49 }
 0x2ec   :  { %v3033_v26 = vpop.eup %3032  ;;  %v2418_v3 = vpop.xlane.xlu0 %2417 }
 0x2ed   :  { %2511 = vst.msk [vmem:[%s4223_s3 + $0xd8] sm:$0xff] %vm2483_vm0, %v3033_v26  ;;  %v2450_v6 = vadd.f32 %v2418_v3, %v4058_v16 }
 0x2ef   :  { %3040 = vtanh.f32 %v2450_v6 }
 0x2f0   :  { %v3035_v30 = vpop.eup %3034 }
 0x2f1   :  { %2512 = vst.msk [vmem:[%s4223_s3 + $0xe0] sm:$0xff] %vm2483_vm0, %v3035_v30 }
 0x2f4   :  { %v3037_v53 = vpop.eup %3036 }
 0x2f5   :  { %2513 = vst.msk [vmem:[%s4223_s3 + $0xe8] sm:$0xff] %vm2483_vm0, %v3037_v53 }
 0x2f8   :  { %v3039_v14 = vpop.eup %3038 }
 0x2f9   :  { %2514 = vst.msk [vmem:[%s4223_s3 + $0xf0] sm:$0xff] %vm2483_vm0, %v3039_v14 }
 0x2fc   :  { %v3041_v16 = vpop.eup %3040 }
 0x2fd   :  { %2515 = vst.msk [vmem:[%s4223_s3 + $0xf8] sm:$0xff] %vm2483_vm0, %v3041_v16 }
 0x2fe   :  { %2520 = vsyncpa [#allocation3], 1 }

</bundles_post_ra>
